<compile_context>
chip_gen: v7x
topology: tpu7x:2x2x1
jax: 0.10.0
libtpu: 0.0.40
codegen_flags: <defaults>
</compile_context>

<pallas_src>
import functools

import jax
import jax.numpy as jnp
from jax import lax
from jax.experimental import pallas as pl
from jax.experimental.pallas import tpu as pltpu

_LANE = 128


def _round_up(x, m):
    return ((x + m - 1) // m) * m


# ---------------------------------------------------------------------------
# Kernel 1: PercentageBasedDetectionHead forward (bt batch elements per step)
# ---------------------------------------------------------------------------
def _detection_head_kernel(hs_ref, q_ref, wf_ref, bf_ref, w2_ref, b2_ref,
                           *out_refs, c1, cpad, dout, return_attention):
    slab_ref = out_refs[0]

    hs = hs_ref[...]                                    # (Bt, P, H) bf16
    q = q_ref[...]                                      # (Q, H)     bf16
    bt, _, h = hs.shape
    nq = q.shape[0]

    # attention = queries @ hidden_states^T : contract H of both operands directly
    qb = jnp.broadcast_to(q[None], (bt, nq, h))
    att = jnp.einsum("bqh,bph->bqp", qb, hs,
                     preferred_element_type=jnp.float32)          # (Bt, Q, P) f32

    # softmax over patches (f32 epilogue; EUP approx reciprocal for the denominator)
    att = att - jnp.max(att, axis=-1, keepdims=True)
    p = jnp.exp(att)
    p = p * pl.reciprocal(jnp.sum(p, axis=-1, keepdims=True), approx=True)

    if return_attention:
        out_refs[1][...] = p.astype(out_refs[1].dtype)

    # attended_features = attn @ hidden_states
    attended = jnp.einsum("bqp,bph->bqh", p.astype(hs.dtype), hs,
                          preferred_element_type=jnp.float32)     # (Bt, Q, H) f32
    a2 = attended.reshape(bt * nq, h).astype(hs.dtype)            # fold batch into M

    # fused [class | pad | bbox-hidden] projection: single (H, Cpad+H) bf16 matmul
    fused = jnp.dot(a2, wf_ref[...], preferred_element_type=jnp.float32)
    fused = fused + bf_ref[...]                                   # f32 bias add

    cls = fused[:, :c1]                                           # (Bt*Q, C1)
    h1 = jnp.maximum(fused[:, cpad:cpad + h], 0.0).astype(hs.dtype)
    box = jnp.dot(h1, w2_ref[...], preferred_element_type=jnp.float32) + b2_ref[...]
    box = jax.nn.sigmoid(box)                                     # (Bt*Q, 4) f32

    # pack [class | box | zero-pad] into one lane-dense slab (width = dout, 128-mult)
    pieces = [cls, box]
    padw = dout - c1 - 4
    if padw > 0:
        pieces.append(jnp.zeros((bt * nq, padw), jnp.float32))
    slab = jnp.concatenate(pieces, axis=-1).reshape(bt, nq, dout)
    slab_ref[...] = slab.astype(slab_ref.dtype)


def detection_head_forward(hidden_states, kp, *, num_classes, bt=1,
                           return_attention=False):
    """hidden_states: [B, P, H].  Returns (classes [B,Q,C1], boxes [B,Q,4][, attn])."""
    B, P, H = hidden_states.shape
    assert B % bt == 0, "bt must divide the batch size"
    C1 = num_classes + 1
    cpad = kp["w_fused"].shape[1] - H
    Q = kp["query_embed"].shape[0]
    dout = _round_up(C1 + 4, _LANE)

    hs = hidden_states.astype(jnp.bfloat16)

    fixed = lambda b: (0, 0)
    out_shape = [jax.ShapeDtypeStruct((B, Q, dout), jnp.float32)]
    out_specs = [pl.BlockSpec((bt, Q, dout), lambda b: (b, 0, 0))]
    if return_attention:
        out_shape.append(jax.ShapeDtypeStruct((B, Q, P), jnp.float32))
        out_specs.append(pl.BlockSpec((bt, Q, P), lambda b: (b, 0, 0)))

    flops = 4 * B * Q * P * H + 2 * B * Q * H * (cpad + H) + 8 * B * Q * H
    bytes_accessed = (2 * B * P * H                                # hs (bf16)
                      + 2 * (Q * H + H * (cpad + H) + 4 * H)       # bf16 weights
                      + 4 * (cpad + H + 4)                         # f32 biases
                      + 4 * B * Q * dout                           # slab output
                      + (4 * B * Q * P if return_attention else 0))

    kernel = functools.partial(_detection_head_kernel, c1=C1, cpad=cpad,
                               dout=dout, return_attention=return_attention)

    outs = pl.pallas_call(
        kernel,
        out_shape=tuple(out_shape),
        grid_spec=pltpu.PrefetchScalarGridSpec(
            num_scalar_prefetch=0,
            grid=(B // bt,),
            in_specs=[
                pl.BlockSpec((bt, P, H), lambda b: (b, 0, 0)),     # hidden_states
                pl.BlockSpec(kp["query_embed"].shape, fixed),      # queries  (Q, H)
                pl.BlockSpec(kp["w_fused"].shape, fixed),          # (H, Cpad+H) bf16
                pl.BlockSpec(kp["b_fused"].shape, fixed),          # (1, Cpad+H) f32
                pl.BlockSpec(kp["w2"].shape, fixed),               # (H, 4) bf16
                pl.BlockSpec(kp["b2"].shape, fixed),               # (1, 4) f32
            ],
            out_specs=tuple(out_specs),
        ),
        compiler_params=pltpu.CompilerParams(
            dimension_semantics=("parallel",),
            vmem_limit_bytes=64 * 1024 * 1024),
        cost_estimate=pl.CostEstimate(flops=int(flops),
                                      transcendentals=int(B * Q * (P + 5)),
                                      bytes_accessed=int(bytes_accessed)),
    )(hs, kp["query_embed"], kp["w_fused"], kp["b_fused"], kp["w2"], kp["b2"])

    slab = outs[0]
    classes = slab[..., :C1]
    boxes = slab[..., C1:C1 + 4]
    if return_attention:
        return classes, boxes, outs[1]
    return classes, boxes


# ---------------------------------------------------------------------------
# Kernel 2: tiled mean-pool over the sequence axis (stage 1 of contrastive loss)
# ---------------------------------------------------------------------------
def _mean_pool_kernel(x_ref, out_ref, *, inv_len):
    k = pl.program_id(1)

    @pl.when(k == 0)
    def _():
        out_ref[...] = jnp.zeros_like(out_ref)

    out_ref[...] += jnp.sum(x_ref[...].astype(jnp.float32), axis=1, keepdims=True)

    @pl.when(k == pl.num_programs(1) - 1)
    def _():
        out_ref[...] = out_ref[...] * inv_len


def _pick_seq_chunk(S, max_chunk=512):
    if S <= max_chunk:
        return S
    for c in range(max_chunk, 7, -1):
        if S % c == 0 and c % 8 == 0:
            return c
    return S


def mean_pool(x):
    """x: [B, S, H] -> [B, H] mean over the sequence axis (f32)."""
    B, S, H = x.shape
    Sc = _pick_seq_chunk(S)
    kernel = functools.partial(_mean_pool_kernel, inv_len=1.0 / S)
    pooled = pl.pallas_call(
        kernel,
        out_shape=jax.ShapeDtypeStruct((B, 1, H), jnp.float32),
        grid_spec=pltpu.PrefetchScalarGridSpec(
            num_scalar_prefetch=0,
            grid=(B, S // Sc),
            in_specs=[pl.BlockSpec((1, Sc, H), lambda b, k: (b, k, 0))],
            out_specs=pl.BlockSpec((1, 1, H), lambda b, k: (b, 0, 0)),
        ),
        compiler_params=pltpu.CompilerParams(
            dimension_semantics=("parallel", "arbitrary"),
            vmem_limit_bytes=64 * 1024 * 1024),
        cost_estimate=pl.CostEstimate(
            flops=int(B * S * H), transcendentals=0,
            bytes_accessed=int(x.dtype.itemsize * B * S * H + 4 * B * H)),
    )(x)
    return pooled[:, 0, :]


def contrastive_loss(vision_features, text_features):
    """CLIP-style single-direction CE, matching _compute_contrastive_loss."""
    v = mean_pool(vision_features)
    t = mean_pool(text_features)
    v = v / jnp.maximum(jnp.sqrt(jnp.sum(v * v, axis=1, keepdims=True)), 1e-12)
    t = t / jnp.maximum(jnp.sqrt(jnp.sum(t * t, axis=1, keepdims=True)), 1e-12)
    sim = jnp.dot(v, t.T) / 0.07
    logp = jax.nn.log_softmax(sim, axis=1)
    return -jnp.mean(jnp.diagonal(logp))


# ---------------------------------------------------------------------------
# Plain-JAX glue: detection loss (class CE + L1 box loss), loss combination
# ---------------------------------------------------------------------------
def detection_loss(pred_classes, pred_boxes, target_classes_in, target_boxes):
    B, Q, C1 = pred_classes.shape
    num_t = min(Q, target_boxes.shape[1])
    target_classes = jnp.zeros((B, Q), dtype=jnp.int32)
    if num_t > 0:
        target_classes = target_classes.at[:, :num_t].set(
            target_classes_in[:, :num_t].astype(jnp.int32) + 1)

    logits = pred_classes.reshape(-1, C1)
    tgt = target_classes.reshape(-1)
    logp = jax.nn.log_softmax(logits, axis=-1)
    class_loss = -jnp.mean(jnp.take_along_axis(logp, tgt[:, None], axis=1))

    if num_t == 0:
        return class_loss
    box_l1 = jnp.abs(pred_boxes[:, :num_t] - target_boxes[:, :num_t])
    box_loss = jnp.mean(jnp.sum(box_l1, axis=-1))
    return class_loss + box_loss


@functools.partial(jax.jit, static_argnames=("num_classes", "bt", "return_attention"))
def multi_task_forward(vision_features, text_features, kparams,
                       det_target_classes, det_target_boxes, *,
                       num_classes, bt=1, return_attention=False):
    """Auxiliary forward path of MultiTaskQwen2VL (base_loss = 0, NER omitted)."""
    det_loss_weight = 0.5
    contrastive_loss_weight = 0.2

    det_out = detection_head_forward(vision_features, kparams,
                                     num_classes=num_classes, bt=bt,
                                     return_attention=return_attention)
    pred_classes, pred_boxes = det_out[0], det_out[1]
    det_loss = detection_loss(pred_classes, pred_boxes,
                              det_target_classes, det_target_boxes)
    con_loss = contrastive_loss(vision_features, text_features)

    base_loss = 0.0  # TODO(synk): base Qwen2-VL LM loss not re-implemented
    combined = base_loss + det_loss_weight * det_loss + contrastive_loss_weight * con_loss
    out = {
        "loss": combined,
        "detection_loss": det_loss,
        "contrastive_loss": con_loss,
        "detection_predictions": {"classes": pred_classes, "boxes": pred_boxes},
    }
    if return_attention:
        out["attention_weights"] = det_out[2]
    return out


# ---------------------------------------------------------------------------
# Parameter init (PyTorch layout) + conversion to kernel layout
# ---------------------------------------------------------------------------
def init_raw_params(key, hidden_size, num_classes, num_queries):
    ks = jax.random.split(key, 8)
    s = 0.02
    return {
        "query_embed": jax.random.normal(ks[0], (num_queries, hidden_size), jnp.float32),
        "class_w": s * jax.random.normal(ks[1], (num_classes + 1, hidden_size), jnp.float32),
        "class_b": s * jax.random.normal(ks[2], (num_classes + 1,), jnp.float32),
        "bbox_w1": s * jax.random.normal(ks[3], (hidden_size, hidden_size), jnp.float32),
        "bbox_b1": s * jax.random.normal(ks[4], (hidden_size,), jnp.float32),
        "bbox_w2": s * jax.random.normal(ks[5], (4, hidden_size), jnp.float32),
        "bbox_b2": s * jax.random.normal(ks[6], (4,), jnp.float32),
    }


def prepare_detection_params(raw):
    """Pre-transpose, lane-pad and fuse weights; cast MXU operands to bf16."""
    H = raw["bbox_w1"].shape[0]
    C1 = raw["class_w"].shape[0]
    cpad = _round_up(C1, _LANE)

    parts_w = [raw["class_w"].T]                       # (H, C1)
    parts_b = [raw["class_b"]]
    if cpad > C1:
        parts_w.append(jnp.zeros((H, cpad - C1), jnp.float32))
        parts_b.append(jnp.zeros((cpad - C1,), jnp.float32))
    parts_w.append(raw["bbox_w1"].T)                   # (H, H)
    parts_b.append(raw["bbox_b1"])

    return {
        "query_embed": raw["query_embed"].astype(jnp.bfloat16),        # (Q, H)
        "w_fused": jnp.concatenate(parts_w, axis=1).astype(jnp.bfloat16),
        "b_fused": jnp.concatenate(parts_b)[None, :].astype(jnp.float32),
        "w2": raw["bbox_w2"].T.astype(jnp.bfloat16),                   # (H, 4)
        "b2": raw["bbox_b2"][None, :].astype(jnp.float32),             # (1, 4)
    }


# ---------------------------------------------------------------------------
# Pure-JAX references (for numerical validation)
# ---------------------------------------------------------------------------
def detection_head_reference(hidden_states, raw):
    q = raw["query_embed"]
    att = jnp.einsum("qh,bph->bqp", q, hidden_states)
    attw = jax.nn.softmax(att, axis=-1)
    attended = jnp.einsum("bqp,bph->bqh", attw, hidden_states)
    cls = attended @ raw["class_w"].T + raw["class_b"]
    h1 = jax.nn.relu(attended @ raw["bbox_w1"].T + raw["bbox_b1"])
    box = jax.nn.sigmoid(h1 @ raw["bbox_w2"].T + raw["bbox_b2"])
    return cls, box, attw


def contrastive_reference(v, t):
    ve = v.mean(axis=1)
    te = t.mean(axis=1)
    ve = ve / jnp.maximum(jnp.linalg.norm(ve, axis=1, keepdims=True), 1e-12)
    te = te / jnp.maximum(jnp.linalg.norm(te, axis=1, keepdims=True), 1e-12)
    sim = ve @ te.T / 0.07
    return -jnp.mean(jnp.diagonal(jax.nn.log_softmax(sim, axis=1)))


if __name__ == "__main__":
    B, P, T, H = 2, 16, 8, 32          # batch, vision patches, text seq, hidden
    NUM_CLASSES, NUM_QUERIES, NUM_GT = 8, 8, 3

    key = jax.random.PRNGKey(0)
    k_v, k_t, k_p, k_c, k_b = jax.random.split(key, 5)

    vision_features = jax.random.normal(k_v, (B, P, H), jnp.float32)
    text_features = jax.random.normal(k_t, (B, T, H), jnp.float32)
    raw_params = init_raw_params(k_p, H, NUM_CLASSES, NUM_QUERIES)
    kparams = prepare_detection_params(raw_params)

    det_target_classes = jax.random.randint(k_c, (B, NUM_GT), 0, NUM_CLASSES)
    det_target_boxes = jax.random.uniform(k_b, (B, NUM_GT, 4), jnp.float32)

    out = multi_task_forward(vision_features, text_features, kparams,
                             det_target_classes, det_target_boxes,
                             num_classes=NUM_CLASSES, bt=1, return_attention=True)
    jax.block_until_ready(out)

    C1 = NUM_CLASSES + 1
    assert out["detection_predictions"]["classes"].shape == (B, NUM_QUERIES, C1)
    assert out["detection_predictions"]["boxes"].shape == (B, NUM_QUERIES, 4)
    assert out["attention_weights"].shape == (B, NUM_QUERIES, P)
    assert bool(jnp.isfinite(out["loss"]))

    # numerical check against a pure-JAX reference (bf16 MXU -> loose tolerances)
    ref_cls, ref_box, ref_attn = detection_head_reference(vision_features, raw_params)
    ref_con = contrastive_reference(vision_features, text_features)
    ref_det = detection_loss(ref_cls, ref_box, det_target_classes, det_target_boxes)

    assert bool(jnp.allclose(out["detection_predictions"]["classes"], ref_cls,
                             atol=3e-2, rtol=0)), "class logits mismatch"
    assert bool(jnp.allclose(out["detection_predictions"]["boxes"], ref_box,
                             atol=3e-2, rtol=0)), "box coords mismatch"
    assert bool(jnp.allclose(out["attention_weights"], ref_attn,
                             atol=5e-2, rtol=0)), "attention weights mismatch"
    assert float(jnp.abs(out["contrastive_loss"] - ref_con)) < 1e-2, "contrastive mismatch"
    assert float(jnp.abs(out["detection_loss"] - ref_det)) < 5e-2, "detection loss mismatch"

    # multi-batch-per-grid-step variant (bt=2), attention output disabled (loss path)
    out2 = multi_task_forward(vision_features, text_features, kparams,
                              det_target_classes, det_target_boxes,
                              num_classes=NUM_CLASSES, bt=2, return_attention=False)
    jax.block_until_ready(out2)
    assert bool(jnp.isfinite(out2["loss"]))
    assert float(jnp.abs(out2["loss"] - out["loss"])) < 5e-3, "bt=1 vs bt=2 mismatch"

    print("KERNEL_OK")
</pallas_src>

<mosaic_0001>
module attributes {stable_mosaic.version = 11 : i64} {
  func.func @_mean_pool_kernel(%arg0: i32, %arg1: i32, %arg2: memref<1x8x32xf32, #tpu.memory_space<vmem>>, %arg3: memref<1x1x32xf32, #tpu.memory_space<vmem>>) attributes {dimension_semantics = [#tpu.dimension_semantics<parallel>, #tpu.dimension_semantics<arbitrary>], iteration_bounds = array<i64: 2, 1>, scalar_prefetch = 0 : i64, scratch_operands = 0 : i64, tpu.core_type = #tpu.core_type<tc>, window_params = [{transform_indices = @transform_0, window_bounds = array<i64: 1, 8, 32>}, {transform_indices = @transform_1, window_bounds = array<i64: 1, 1, 32>}]} {
    %c0_i32 = arith.constant 0 : i32
    %0 = arith.cmpi eq, %arg1, %c0_i32 : i32
    %1 = arith.extui %0 : i1 to i32
    %c0_i32_0 = arith.constant 0 : i32
    %2 = arith.cmpi ne, %1, %c0_i32_0 : i32
    scf.if %2 {
      %cst_11 = arith.constant 0.000000e+00 : f32
      %12 = vector.broadcast %cst_11 : f32 to vector<1x1x32xf32>
      %c0_12 = arith.constant 0 : index
      %c0_13 = arith.constant 0 : index
      %c0_14 = arith.constant 0 : index
      %13 = vector.load %arg3[%c0_12, %c0_13, %c0_14] : memref<1x1x32xf32, #tpu.memory_space<vmem>>, vector<1x1x32xf32>
      tpu.vector_store %arg3[%c0_12, %c0_13, %c0_14], %12 {strides = array<i32>} : memref<1x1x32xf32, #tpu.memory_space<vmem>>, vector<1x1x32xf32>,
    } else {
    }
    %c0 = arith.constant 0 : index
    %c0_1 = arith.constant 0 : index
    %c0_2 = arith.constant 0 : index
    %3 = vector.load %arg3[%c0, %c0_1, %c0_2] : memref<1x1x32xf32, #tpu.memory_space<vmem>>, vector<1x1x32xf32>
    %c0_3 = arith.constant 0 : index
    %c0_4 = arith.constant 0 : index
    %c0_5 = arith.constant 0 : index
    %4 = vector.load %arg2[%c0_3, %c0_4, %c0_5] : memref<1x8x32xf32, #tpu.memory_space<vmem>>, vector<1x8x32xf32>
    %cst = arith.constant dense<0.000000e+00> : vector<1x32xf32>
    %5 = vector.multi_reduction <add>, %4, %cst [1] : vector<1x8x32xf32> to vector<1x32xf32>
    %6 = vector.shape_cast %5 : vector<1x32xf32> to vector<1x1x32xf32>
    %7 = arith.addf %3, %6 : vector<1x1x32xf32>
    %c0_6 = arith.constant 0 : index
    %c0_7 = arith.constant 0 : index
    %c0_8 = arith.constant 0 : index
    %8 = vector.load %arg3[%c0_6, %c0_7, %c0_8] : memref<1x1x32xf32, #tpu.memory_space<vmem>>, vector<1x1x32xf32>
    tpu.vector_store %arg3[%c0_6, %c0_7, %c0_8], %7 {strides = array<i32>} : memref<1x1x32xf32, #tpu.memory_space<vmem>>, vector<1x1x32xf32>,
    %c0_i32_9 = arith.constant 0 : i32
    %9 = arith.cmpi eq, %arg1, %c0_i32_9 : i32
    %10 = arith.extui %9 : i1 to i32
    %c0_i32_10 = arith.constant 0 : i32
    %11 = arith.cmpi ne, %10, %c0_i32_10 : i32
    scf.if %11 {
      %c0_11 = arith.constant 0 : index
      %c0_12 = arith.constant 0 : index
      %c0_13 = arith.constant 0 : index
      %12 = vector.load %arg3[%c0_11, %c0_12, %c0_13] : memref<1x1x32xf32, #tpu.memory_space<vmem>>, vector<1x1x32xf32>
      %cst_14 = arith.constant 1.250000e-01 : f32
      %13 = vector.broadcast %cst_14 : f32 to vector<1x1x32xf32>
      %14 = arith.mulf %12, %13 : vector<1x1x32xf32>
      %c0_15 = arith.constant 0 : index
      %c0_16 = arith.constant 0 : index
      %c0_17 = arith.constant 0 : index
      %15 = vector.load %arg3[%c0_15, %c0_16, %c0_17] : memref<1x1x32xf32, #tpu.memory_space<vmem>>, vector<1x1x32xf32>
      tpu.vector_store %arg3[%c0_15, %c0_16, %c0_17], %14 {strides = array<i32>} : memref<1x1x32xf32, #tpu.memory_space<vmem>>, vector<1x1x32xf32>,
    } else {
    }
    return
  }
  func.func @transform_0(%arg0: i32, %arg1: i32) -> (i32, i32, i32) {
    %c0_i32 = arith.constant 0 : i32
    %c0_i32_0 = arith.constant 0 : i32
    return %arg0, %arg1, %c0_i32 : i32, i32, i32
  }
  func.func @transform_1(%arg0: i32, %arg1: i32) -> (i32, i32, i32) {
    %c0_i32 = arith.constant 0 : i32
    %c0_i32_0 = arith.constant 0 : i32
    %c0_i32_1 = arith.constant 0 : i32
    return %arg0, %c0_i32, %c0_i32_0 : i32, i32, i32
  }
}

module attributes {stable_mosaic.version = 11 : i64} {
  func.func @_mean_pool_kernel(%arg0: i32, %arg1: i32, %arg2: memref<1x16x32xf32, #tpu.memory_space<vmem>>, %arg3: memref<1x1x32xf32, #tpu.memory_space<vmem>>) attributes {dimension_semantics = [#tpu.dimension_semantics<parallel>, #tpu.dimension_semantics<arbitrary>], iteration_bounds = array<i64: 2, 1>, scalar_prefetch = 0 : i64, scratch_operands = 0 : i64, tpu.core_type = #tpu.core_type<tc>, window_params = [{transform_indices = @transform_0, window_bounds = array<i64: 1, 16, 32>}, {transform_indices = @transform_1, window_bounds = array<i64: 1, 1, 32>}]} {
    %c0_i32 = arith.constant 0 : i32
    %0 = arith.cmpi eq, %arg1, %c0_i32 : i32
    %1 = arith.extui %0 : i1 to i32
    %c0_i32_0 = arith.constant 0 : i32
    %2 = arith.cmpi ne, %1, %c0_i32_0 : i32
    scf.if %2 {
      %cst_11 = arith.constant 0.000000e+00 : f32
      %12 = vector.broadcast %cst_11 : f32 to vector<1x1x32xf32>
      %c0_12 = arith.constant 0 : index
      %c0_13 = arith.constant 0 : index
      %c0_14 = arith.constant 0 : index
      %13 = vector.load %arg3[%c0_12, %c0_13, %c0_14] : memref<1x1x32xf32, #tpu.memory_space<vmem>>, vector<1x1x32xf32>
      tpu.vector_store %arg3[%c0_12, %c0_13, %c0_14], %12 {strides = array<i32>} : memref<1x1x32xf32, #tpu.memory_space<vmem>>, vector<1x1x32xf32>,
    } else {
    }
    %c0 = arith.constant 0 : index
    %c0_1 = arith.constant 0 : index
    %c0_2 = arith.constant 0 : index
    %3 = vector.load %arg3[%c0, %c0_1, %c0_2] : memref<1x1x32xf32, #tpu.memory_space<vmem>>, vector<1x1x32xf32>
    %c0_3 = arith.constant 0 : index
    %c0_4 = arith.constant 0 : index
    %c0_5 = arith.constant 0 : index
    %4 = vector.load %arg2[%c0_3, %c0_4, %c0_5] : memref<1x16x32xf32, #tpu.memory_space<vmem>>, vector<1x16x32xf32>
    %cst = arith.constant dense<0.000000e+00> : vector<1x32xf32>
    %5 = vector.multi_reduction <add>, %4, %cst [1] : vector<1x16x32xf32> to vector<1x32xf32>
    %6 = vector.shape_cast %5 : vector<1x32xf32> to vector<1x1x32xf32>
    %7 = arith.addf %3, %6 : vector<1x1x32xf32>
    %c0_6 = arith.constant 0 : index
    %c0_7 = arith.constant 0 : index
    %c0_8 = arith.constant 0 : index
    %8 = vector.load %arg3[%c0_6, %c0_7, %c0_8] : memref<1x1x32xf32, #tpu.memory_space<vmem>>, vector<1x1x32xf32>
    tpu.vector_store %arg3[%c0_6, %c0_7, %c0_8], %7 {strides = array<i32>} : memref<1x1x32xf32, #tpu.memory_space<vmem>>, vector<1x1x32xf32>,
    %c0_i32_9 = arith.constant 0 : i32
    %9 = arith.cmpi eq, %arg1, %c0_i32_9 : i32
    %10 = arith.extui %9 : i1 to i32
    %c0_i32_10 = arith.constant 0 : i32
    %11 = arith.cmpi ne, %10, %c0_i32_10 : i32
    scf.if %11 {
      %c0_11 = arith.constant 0 : index
      %c0_12 = arith.constant 0 : index
      %c0_13 = arith.constant 0 : index
      %12 = vector.load %arg3[%c0_11, %c0_12, %c0_13] : memref<1x1x32xf32, #tpu.memory_space<vmem>>, vector<1x1x32xf32>
      %cst_14 = arith.constant 6.250000e-02 : f32
      %13 = vector.broadcast %cst_14 : f32 to vector<1x1x32xf32>
      %14 = arith.mulf %12, %13 : vector<1x1x32xf32>
      %c0_15 = arith.constant 0 : index
      %c0_16 = arith.constant 0 : index
      %c0_17 = arith.constant 0 : index
      %15 = vector.load %arg3[%c0_15, %c0_16, %c0_17] : memref<1x1x32xf32, #tpu.memory_space<vmem>>, vector<1x1x32xf32>
      tpu.vector_store %arg3[%c0_15, %c0_16, %c0_17], %14 {strides = array<i32>} : memref<1x1x32xf32, #tpu.memory_space<vmem>>, vector<1x1x32xf32>,
    } else {
    }
    return
  }
  func.func @transform_0(%arg0: i32, %arg1: i32) -> (i32, i32, i32) {
    %c0_i32 = arith.constant 0 : i32
    %c0_i32_0 = arith.constant 0 : i32
    return %arg0, %arg1, %c0_i32 : i32, i32, i32
  }
  func.func @transform_1(%arg0: i32, %arg1: i32) -> (i32, i32, i32) {
    %c0_i32 = arith.constant 0 : i32
    %c0_i32_0 = arith.constant 0 : i32
    %c0_i32_1 = arith.constant 0 : i32
    return %arg0, %c0_i32, %c0_i32_0 : i32, i32, i32
  }
}

module attributes {stable_mosaic.version = 11 : i64} {
  func.func @_detection_head_kernel(%arg0: i32, %arg1: memref<1x16x32xbf16, #tpu.memory_space<vmem>>, %arg2: memref<8x32xbf16, #tpu.memory_space<vmem>>, %arg3: memref<32x160xbf16, #tpu.memory_space<vmem>>, %arg4: memref<1x160xf32, #tpu.memory_space<vmem>>, %arg5: memref<32x4xbf16, #tpu.memory_space<vmem>>, %arg6: memref<1x4xf32, #tpu.memory_space<vmem>>, %arg7: memref<1x8x128xf32, #tpu.memory_space<vmem>>, %arg8: memref<1x8x16xf32, #tpu.memory_space<vmem>>) attributes {dimension_semantics = [#tpu.dimension_semantics<parallel>], iteration_bounds = array<i64: 2>, scalar_prefetch = 0 : i64, scratch_operands = 0 : i64, tpu.core_type = #tpu.core_type<tc>, window_params = [{transform_indices = @transform_0, window_bounds = array<i64: 1, 16, 32>}, {pipeline_mode = #tpu.pipeline_mode<synchronous>, transform_indices = @transform_1, window_bounds = array<i64: 8, 32>}, {pipeline_mode = #tpu.pipeline_mode<synchronous>, transform_indices = @transform_2, window_bounds = array<i64: 32, 160>}, {pipeline_mode = #tpu.pipeline_mode<synchronous>, transform_indices = @transform_3, window_bounds = array<i64: 1, 160>}, {pipeline_mode = #tpu.pipeline_mode<synchronous>, transform_indices = @transform_4, window_bounds = array<i64: 32, 4>}, {pipeline_mode = #tpu.pipeline_mode<synchronous>, transform_indices = @transform_5, window_bounds = array<i64: 1, 4>}, {transform_indices = @transform_6, window_bounds = array<i64: 1, 8, 128>}, {transform_indices = @transform_7, window_bounds = array<i64: 1, 8, 16>}]} {
    %c0 = arith.constant 0 : index
    %c0_0 = arith.constant 0 : index
    %c0_1 = arith.constant 0 : index
    %0 = vector.load %arg1[%c0, %c0_0, %c0_1] : memref<1x16x32xbf16, #tpu.memory_space<vmem>>, vector<1x16x32xbf16>
    %c0_2 = arith.constant 0 : index
    %c0_3 = arith.constant 0 : index
    %1 = vector.load %arg2[%c0_2, %c0_3] : memref<8x32xbf16, #tpu.memory_space<vmem>>, vector<8x32xbf16>
    %2 = vector.shape_cast %1 : vector<8x32xbf16> to vector<1x8x32xbf16>
    "tpu.trace_start"() <{level = 10 : i32, message = "bqh,bph->bqp"}> : () -> ()
    %cst = arith.constant dense<0.000000e+00> : vector<1x8x16xf32>
    %3 = tpu.matmul %2, %0, %cst {dimension_numbers = #tpu.dot_dimension_numbers<[2], [2], [1], [1], [0, 0, 0, 1, 1, 1], [0], [0]>} : vector<1x8x32xbf16>, vector<1x16x32xbf16>, vector<1x8x16xf32> -> vector<1x8x16xf32>
    "tpu.trace_stop"() : () -> ()
    %cst_4 = arith.constant dense<0xFF800000> : vector<1x8xf32>
    %4 = vector.multi_reduction <maximumf>, %3, %cst_4 [2] : vector<1x8x16xf32> to vector<1x8xf32>
    %5 = vector.shape_cast %4 : vector<1x8xf32> to vector<1x8x1xf32>
    %6 = vector.broadcast %5 : vector<1x8x1xf32> to vector<1x8x16xf32>
    %7 = arith.subf %3, %6 : vector<1x8x16xf32>
    %8 = math.exp %7 : vector<1x8x16xf32>
    %cst_5 = arith.constant dense<0.000000e+00> : vector<1x8xf32>
    %9 = vector.multi_reduction <add>, %8, %cst_5 [2] : vector<1x8x16xf32> to vector<1x8xf32>
    %10 = vector.shape_cast %9 : vector<1x8xf32> to vector<1x8x1xf32>
    %11 = tpu.reciprocal %10 {approx = true} : vector<1x8x1xf32> -> vector<1x8x1xf32>
    %12 = vector.broadcast %11 : vector<1x8x1xf32> to vector<1x8x16xf32>
    %13 = arith.mulf %8, %12 : vector<1x8x16xf32>
    %c0_6 = arith.constant 0 : index
    %c0_7 = arith.constant 0 : index
    %c0_8 = arith.constant 0 : index
    %14 = vector.load %arg8[%c0_6, %c0_7, %c0_8] : memref<1x8x16xf32, #tpu.memory_space<vmem>>, vector<1x8x16xf32>
    tpu.vector_store %arg8[%c0_6, %c0_7, %c0_8], %13 {strides = array<i32>} : memref<1x8x16xf32, #tpu.memory_space<vmem>>, vector<1x8x16xf32>,
    %15 = arith.truncf %13 : vector<1x8x16xf32> to vector<1x8x16xbf16>
    "tpu.trace_start"() <{level = 10 : i32, message = "bqp,bph->bqh"}> : () -> ()
    %cst_9 = arith.constant dense<0.000000e+00> : vector<1x8x32xf32>
    %16 = tpu.matmul %15, %0, %cst_9 {dimension_numbers = #tpu.dot_dimension_numbers<[2], [1], [1], [2], [0, 0, 0, 1, 1, 2], [0], [0]>} : vector<1x8x16xbf16>, vector<1x16x32xbf16>, vector<1x8x32xf32> -> vector<1x8x32xf32>
    "tpu.trace_stop"() : () -> ()
    %17 = vector.shape_cast %16 : vector<1x8x32xf32> to vector<8x32xf32>
    %18 = arith.truncf %17 : vector<8x32xf32> to vector<8x32xbf16>
    %c0_10 = arith.constant 0 : index
    %c0_11 = arith.constant 0 : index
    %19 = vector.load %arg3[%c0_10, %c0_11] : memref<32x160xbf16, #tpu.memory_space<vmem>>, vector<32x160xbf16>
    %cst_12 = arith.constant dense<0.000000e+00> : vector<8x160xf32>
    %20 = tpu.matmul %18, %19, %cst_12 {dimension_numbers = #tpu.dot_dimension_numbers<[1], [0], [0], [1], [0, 0, 1, 1], [], []>} : vector<8x32xbf16>, vector<32x160xbf16>, vector<8x160xf32> -> vector<8x160xf32>
    %c0_13 = arith.constant 0 : index
    %c0_14 = arith.constant 0 : index
    %21 = vector.load %arg4[%c0_13, %c0_14] : memref<1x160xf32, #tpu.memory_space<vmem>>, vector<1x160xf32>
    %22 = vector.broadcast %21 : vector<1x160xf32> to vector<8x160xf32>
    %23 = arith.addf %20, %22 : vector<8x160xf32>
    %24 = vector.extract_strided_slice %23 {offsets = [0, 0], sizes = [8, 9], strides = [1, 1]} : vector<8x160xf32> to vector<8x9xf32>
    %25 = vector.extract_strided_slice %23 {offsets = [0, 128], sizes = [8, 32], strides = [1, 1]} : vector<8x160xf32> to vector<8x32xf32>
    %cst_15 = arith.constant 0.000000e+00 : f32
    %26 = vector.broadcast %cst_15 : f32 to vector<8x32xf32>
    %27 = arith.maximumf %25, %26 : vector<8x32xf32>
    %28 = arith.truncf %27 : vector<8x32xf32> to vector<8x32xbf16>
    %c0_16 = arith.constant 0 : index
    %c0_17 = arith.constant 0 : index
    %29 = vector.load %arg5[%c0_16, %c0_17] : memref<32x4xbf16, #tpu.memory_space<vmem>>, vector<32x4xbf16>
    %cst_18 = arith.constant dense<0.000000e+00> : vector<8x4xf32>
    %30 = tpu.matmul %28, %29, %cst_18 {dimension_numbers = #tpu.dot_dimension_numbers<[1], [0], [0], [1], [0, 0, 1, 1], [], []>} : vector<8x32xbf16>, vector<32x4xbf16>, vector<8x4xf32> -> vector<8x4xf32>
    %c0_19 = arith.constant 0 : index
    %c0_20 = arith.constant 0 : index
    %31 = vector.load %arg6[%c0_19, %c0_20] : memref<1x4xf32, #tpu.memory_space<vmem>>, vector<1x4xf32>
    %32 = vector.broadcast %31 : vector<1x4xf32> to vector<8x4xf32>
    %33 = arith.addf %30, %32 : vector<8x4xf32>
    %34 = arith.negf %33 : vector<8x4xf32>
    %35 = math.exp %34 : vector<8x4xf32>
    %cst_21 = arith.constant 1.000000e+00 : f32
    %36 = vector.broadcast %cst_21 : f32 to vector<8x4xf32>
    %37 = arith.addf %36, %35 : vector<8x4xf32>
    %38 = arith.divf %36, %37 : vector<8x4xf32>
    %cst_22 = arith.constant 0.000000e+00 : f32
    %39 = vector.broadcast %cst_22 : f32 to vector<8x115xf32>
    %40 = tpu.concatenate %24, %38, %39 in 1 : vector<8x9xf32>, vector<8x4xf32>, vector<8x115xf32> -> vector<8x128xf32>
    %41 = vector.shape_cast %40 : vector<8x128xf32> to vector<1x8x128xf32>
    %c0_23 = arith.constant 0 : index
    %c0_24 = arith.constant 0 : index
    %c0_25 = arith.constant 0 : index
    %42 = vector.load %arg7[%c0_23, %c0_24, %c0_25] : memref<1x8x128xf32, #tpu.memory_space<vmem>>, vector<1x8x128xf32>
    tpu.vector_store %arg7[%c0_23, %c0_24, %c0_25], %41 {strides = array<i32>} : memref<1x8x128xf32, #tpu.memory_space<vmem>>, vector<1x8x128xf32>,
    return
  }
  func.func @transform_0(%arg0: i32) -> (i32, i32, i32) {
    %c0_i32 = arith.constant 0 : i32
    %c0_i32_0 = arith.constant 0 : i32
    %c0_i32_1 = arith.constant 0 : i32
    return %arg0, %c0_i32, %c0_i32_0 : i32, i32, i32
  }
  func.func @transform_1(%arg0: i32) -> (i32, i32) {
    %c0_i32 = arith.constant 0 : i32
    %c0_i32_0 = arith.constant 0 : i32
    %c0_i32_1 = arith.constant 0 : i32
    return %c0_i32, %c0_i32_0 : i32, i32
  }
  func.func @transform_2(%arg0: i32) -> (i32, i32) {
    %c0_i32 = arith.constant 0 : i32
    %c0_i32_0 = arith.constant 0 : i32
    %c0_i32_1 = arith.constant 0 : i32
    return %c0_i32, %c0_i32_0 : i32, i32
  }
  func.func @transform_3(%arg0: i32) -> (i32, i32) {
    %c0_i32 = arith.constant 0 : i32
    %c0_i32_0 = arith.constant 0 : i32
    %c0_i32_1 = arith.constant 0 : i32
    return %c0_i32, %c0_i32_0 : i32, i32
  }
  func.func @transform_4(%arg0: i32) -> (i32, i32) {
    %c0_i32 = arith.constant 0 : i32
    %c0_i32_0 = arith.constant 0 : i32
    %c0_i32_1 = arith.constant 0 : i32
    return %c0_i32, %c0_i32_0 : i32, i32
  }
  func.func @transform_5(%arg0: i32) -> (i32, i32) {
    %c0_i32 = arith.constant 0 : i32
    %c0_i32_0 = arith.constant 0 : i32
    %c0_i32_1 = arith.constant 0 : i32
    return %c0_i32, %c0_i32_0 : i32, i32
  }
  func.func @transform_6(%arg0: i32) -> (i32, i32, i32) {
    %c0_i32 = arith.constant 0 : i32
    %c0_i32_0 = arith.constant 0 : i32
    %c0_i32_1 = arith.constant 0 : i32
    return %arg0, %c0_i32, %c0_i32_0 : i32, i32, i32
  }
  func.func @transform_7(%arg0: i32) -> (i32, i32, i32) {
    %c0_i32 = arith.constant 0 : i32
    %c0_i32_0 = arith.constant 0 : i32
    %c0_i32_1 = arith.constant 0 : i32
    return %arg0, %c0_i32, %c0_i32_0 : i32, i32, i32
  }
}

</mosaic_0001>

<bundles_post_ra>
// kernel: multi_task_forward.5
= control target key start
LH: loop header
LB: loop body
LE: loop exit
PB: predicated region body
PF: predicated region fallthrough
CT: control target
= control target key end

     0   :  { %6 = vsyncpa [#allocation3], 0  ;;  %s636_s0 = inlined_call_operand.hbm [shape: f32[2,8,32], index: 0, kind: input, shape index: {}]   ;;  %s637_s1 = inlined_call_operand.hbm [shape: f32[2,1,32], index: 1, kind: output, shape index: {}]  }
   0x1   :  { %8 = vsyncpa [#allocation3 + $0x1], 0 }
   0x2   :  { %9 = vsyncpa [#allocation4], 0 }
   0x3   :  { %11 = vsyncpa [#allocation4 + $0x1], 0  ;;  %s460_s6 = smov 0   ;;  %s462_s7 = smov 0  }
   0x4   :  { %s464_s8 = smov 0   ;;  %s466_s9 = smov 0  }
   0x5   :  { %s468_s10 = smov 0   ;;  %s470_s11 = smov 0  }
   0x6 LB: > { %s259_s12 = sadd.s32 4294967295, %s445_s11   ;;  %s260_s13 = sadd.s32 4294967294, %s445_s11   ;;  %s445_s11 = sphi %s470_s11, %s17_s11   ;;  %s441_s10 = sphi %s468_s10, %s653_s10   ;;  %s437_s9 = sphi %s466_s9, %s652_s9   ;;  %s433_s8 = sphi %s464_s8, %s651_s8   ;;  %s429_s7 = sphi %s462_s7, %s650_s7   ;;  %s425_s6 = sphi %s460_s6, %s649_s6  }
   0x7   : > { %s29_s14 = sadd.s32 1, %s441_s10  ;;  %s38_s15 = sadd.s32 1, %s433_s8 }
   0x8   : > { %p31_p0 = scmp.ge.s32.totalorder %s29_s14, 2  ;;  %p45_p1 = scmp.ne.s32.totalorder %s433_s8, %s429_s7 }
   0x9   : > { %p46_p2 = scmp.eq.s32.totalorder %s445_s11, 0  ;;  %p51_p3 = scmp.ne.s32.totalorder %s429_s7, %s425_s6 }
   0xa   : > { %s655_s14 = smov (%p31_p0, %s29_s14), 0  ;;  %p52_p5 = scmp.eq.s32.totalorder %s259_s12, 0 }
   0xb   : > { %p501_p4 = por %p46_p2, %p45_p1  ;;  %s33_s17 = ssub.s32 %s441_s10, %s655_s14 }
   0xc   : > { %p75_p6 = scmp.eq.s32.totalorder %s259_s12, 1  ;;  %p36_p7 = scmp.eq.s32.totalorder %s33_s17, 0 }
   0xd   : > { %p507_p8 = por %p52_p5, %p51_p3  ;;  %p81_p10 = scmp.eq.s32.totalorder %s260_s13, 1 }
   0xe   : > { %p511_p9 = por %p75_p6, %p45_p1  ;;  %p282_p13 = scmp.lt.s32.totalorder %s445_s11, 2 }
   0xf   : > { %s516_s20 = scalar_select %p36_p7, %s433_s8, %s38_s15  }
  0x10   : > { %s641_s19 = scalar_select %p511_p9, 1, 0 }
  0x11   : > { %p518_p11 = por %p81_p10, %p51_p3  ;;  %s101_s22 = sand.u32 1, %s433_s8  }
  0x12   : > { %s263_s23 = sshll.u32 %s101_s22, 3  ;;  %s264_s24 = sshll.u32 %s441_s10, 7 }
  0x13   : > { %s642_s21 = scalar_select %p518_p11, 1, 0 }
  0x14   : > { %s529_s27 = scalar_lea.hbm %s636_s0, %s264_s24  ;;  %s105_s28 = scalar_lea.vmem [#allocation2], %s263_s23 }
  0x15   : > { %s113_s29 = sshll.u32 %s105_s28, 4  ;;  %p535_p0 = pnand %p282_p13, %p501_p4  ;;  %s531_s29 = int_to_ptr.vmem [resolvable:$true] %s113_s29 }
  0x16   : > { %s102_s2 = scalar_lea.sflag [#allocation3], %s101_s22  ;;  %s333_s3 = scalar_lea.hbm %s529_s27, 128 }
  0x17   : > { %p334_p3 = scmp.ne.s32.totalorder %s529_s27, %s333_s3  ;;  %p335_p5 = pneg %p535_p0 }
  0x18   : > { %s338_s12 = scalar_lea.hbm %s636_s0, 256  ;;  %p339_p4 = scmp.lt.u32.totalorder %s529_s27, %s636_s0 }
  0x19   : > { %p336_p6 = pnand %p335_p5, %p334_p3  ;;  %p340_p10 = scmp.lt.u32.totalorder %s338_s12, %s333_s3 }
  0x1a   : > { %p342_p12 = scmp.lt.u32.totalorder %s333_s3, %s529_s27 }
  0x1b   : > { %p337_p7 = pneg %p336_p6  ;;  %p341_p13 = por %p340_p10, %p339_p4 }
  0x1d   : > { %p343_p1 = por %p342_p12, %p341_p13 }
  0x1f   : > { %p344_p2 = pnand %p343_p1, %p337_p7 }
  0x21   : > { %347 = shalt.err (!%p344_p2)
}
  0x22   : > { %s348_s16 = scalar_lea.vmem %s531_s29, 128  ;;  %s447_s17 = smov [#allocation2]  }
  0x23   : > { %p349_p3 = scmp.ne.s32.totalorder %s531_s29, %s348_s16  ;;  %s353_s22 = sshll.u32 %s447_s17, 4  ;;  %s354_s22 = int_to_ptr.vmem [resolvable:$false] %s353_s22 }
  0x24   : > { %s355_s23 = scalar_lea.vmem %s354_s22, 256  ;;  %p356_p9 = scmp.lt.s32.totalorder %s531_s29, %s354_s22 }
  0x25   : > { %p351_p6 = pnand %p349_p3, %p335_p5  ;;  %p357_p4 = scmp.lt.s32.totalorder %s355_s23, %s348_s16 }
  0x27   : > { %p352_p11 = pneg %p351_p6  ;;  %p358_p10 = por %p357_p4, %p356_p9 }
  0x29   : > { %p359_p12 = pnand %p358_p10, %p352_p11 }
  0x2b   : > { %362 = shalt.err (!%p359_p12)
}
  0x2c   : > { %277 = dma.hbm_to_vmem [thread:$0]  (!%p535_p0), %s529_s27, 128, %s531_s29, %s102_s2  }
  0x2d   : > { %p644_p1 = scmp.lt.s32.totalorder %s445_s11, 3  ;;  %p645_p2 = scmp.ge.s32.totalorder %s445_s11, 1 }
  0x2f   : > { %p119_p5 = pnand %p645_p2, %p644_p1 }
  0x30   : > { %s571_s24 = sand.u32 (!%p119_p5), 1, %s429_s7  }
  0x31   : > { %122 = sbr.rel (%p119_p5) target bundleno = 97 (0x61), region = 24  ;;  %s266_s25 = sshll.u32 (!%p119_p5), %s571_s24, 3 }
  0x32   : > { %s125_s26 = scalar_lea.sflag (!%p119_p5), [#allocation3], %s571_s24  ;;  %s128_s28 = scalar_lea.vmem (!%p119_p5), [#allocation2], %s266_s25 }
  0x38   : > { %416 = dma.done.wait (%p507_p8), %s125_s26, 128  }
  0x39   : > { %418 = vsyncadd (%p507_p8), %s125_s26, 4294967168  ;;  %vm150_vm0 = vcmask 253952   ;;  %s145_s27 = scalar_lea.vmem [#allocation5], %s571_s24  ;;  %v448_v0 = vmov 0.0   ;;  %vm154_vm1 = vcmask 261120   ;;  %v153_v1 = vld [vmem:[%s128_s28] sm:$0xff] }
  0x3a   : > { %151 = vst.msk [vmem:[%s145_s27] sm:$0x1] %vm150_vm0, %v448_v0  ;;  %v155_v2 = vsel %vm154_vm1, %v153_v1, 0.0  ;;  %s267_s18 = sshll.u32 %s437_s9, 4  ;;  %s184_s29 = sshll.u32 %s145_s27, 4  ;;  %s588_s29 = int_to_ptr.vmem [resolvable:$true] %s184_s29 }
  0x3b   : > { %v156_v3 = vrot.slane %v155_v2, 4  ;;  %s586_s3 = scalar_lea.hbm %s637_s1, %s267_s18  ;;  %s172_s4 = scalar_lea.sflag [#allocation4], %s571_s24 }
  0x3c   : > { %s363_s5 = scalar_lea.vmem %s588_s29, 16  ;;  %p646_p9 = scmp.ne.s32.totalorder %s641_s19, 0 }
  0x3d   : > { %v157_v4 = vadd.f32 %v156_v3, %v155_v2  ;;  %p364_p8 = scmp.ne.s32.totalorder %s588_s29, %s363_s5  ;;  %s449_s9 = smov [#allocation5]  }
  0x3e   : > { %s367_s12 = sshll.u32 %s449_s9, 4  ;;  %s368_s12 = int_to_ptr.vmem [resolvable:$false] %s367_s12 }
  0x3f   : > { %v158_v5 = vrot.slane %v157_v4, 2  ;;  %p365_p11 = pnand %p364_p8, %p646_p9  ;;  %s369_s13 = scalar_lea.vmem %s368_s12, 32 }
  0x40   : > { %p370_p7 = scmp.lt.s32.totalorder %s588_s29, %s368_s12  ;;  %p371_p13 = scmp.lt.s32.totalorder %s369_s13, %s363_s5 }
  0x41   : > { %v159_v6 = vadd.f32 %v158_v5, %v157_v4  ;;  %v152_v8 = vld [vmem:[%s145_s27] sm:$0x1]  ;;  %p366_p0 = pneg %p365_p11 }
  0x42   : > { %p372_p3 = por %p371_p13, %p370_p7 }
  0x43   : > { %v160_v7 = vrot.slane %v159_v6, 1 }
  0x44   : > { %p373_p6 = pnand %p372_p3, %p366_p0 }
  0x45   : > { %v161_v9 = vadd.f32 %v160_v7, %v159_v6 }
  0x47   : > { %v162_v10 = vadd.f32 %v161_v9, %v152_v8 }
  0x49   : > { %164 = vst.msk [vmem:[%s145_s27] sm:$0x1] %vm150_vm0, %v162_v10 }
  0x50   : > { %v168_v11 = vld [vmem:[%s145_s27] sm:$0x1] }
  0x51   : > { %v169_v12 = vmul.f32 0.125, %v168_v11 }
  0x53   : > { %170 = vst.msk [vmem:[%s145_s27] sm:$0x1] %vm150_vm0, %v169_v12 }
  0x54   : > { %376 = shalt.err (!%p373_p6)
}
  0x55   : > { %s377_s15 = scalar_lea.hbm %s586_s3, 16  ;;  %s381_s22 = scalar_lea.hbm %s637_s1, 32 }
  0x56   : > { %p378_p4 = scmp.ne.s32.totalorder %s586_s3, %s377_s15  ;;  %p382_p1 = scmp.lt.u32.totalorder %s586_s3, %s637_s1 }
  0x57   : > { %p383_p2 = scmp.lt.u32.totalorder %s381_s22, %s377_s15  ;;  %p385_p8 = scmp.lt.u32.totalorder %s377_s15, %s586_s3 }
  0x58   : > { %p379_p10 = pnand %p378_p4, %p646_p9 }
  0x59   : > { %p384_p5 = por %p383_p2, %p382_p1 }
  0x5a   : > { %p380_p12 = pneg %p379_p10 }
  0x5b   : > { %p386_p11 = por %p385_p8, %p384_p5 }
  0x5d   : > { %p387_p0 = pnand %p386_p11, %p380_p12 }
  0x5f   : > { %390 = shalt.err (!%p387_p0)
}
  0x60   : > { %272 = dma.vmem_to_hbm [thread:$0]  (%p646_p9), %s588_s29, 16, %s586_s3, %s172_s4  }
  0x61 PF: > { %s196_s25 = sand.u32 1, %s425_s6   ;;  %p647_p7 = scmp.ne.s32.totalorder %s642_s21, 0 }
  0x62   : > { %p648_p13 = scmp.ge.s32.totalorder %s445_s11, 2  ;;  %s197_s26 = scalar_lea.sflag [#allocation4], %s196_s25 }
  0x64   : > { %p279_p3 = pnand %p648_p13, %p647_p7 }
  0x66   : > { %420 = dma.done.wait (!%p279_p3), %s197_s26, 16  }
  0x67   : > { %422 = vsyncadd (!%p279_p3), %s197_s26, 4294967280  ;;  %s17_s11 = sadd.s32 1, %s445_s11   ;;  %s649_s6 = smov %s429_s7 }
  0x68   : > { %p14_p6 = scmp.ge.s32.totalorder %s17_s11, 4   ;;  %s650_s7 = smov %s433_s8 }
  0x69   : > { %s651_s8 = smov %s516_s20  ;;  %s652_s9 = smov %s441_s10 }
  0x6a   : > { %s653_s10 = smov %s655_s14  ;;  %16 = sbr.rel (!%p14_p6) target bundleno = 6 (0x6), region = 77 }
  0x71   :  { %201 = vsyncpa [#allocation3], 1 }
  0x72   :  { %203 = vsyncpa [#allocation3 + $0x1], 1 }
  0x73   :  { %204 = vsyncpa [#allocation4], 1 }
  0x74   :  { %206 = vsyncpa [#allocation4 + $0x1], 1 }

// kernel: multi_task_forward.4
= control target key start
LH: loop header
LB: loop body
LE: loop exit
PB: predicated region body
PF: predicated region fallthrough
CT: control target
= control target key end

     0   :  { %6 = vsyncpa [#allocation3], 0  ;;  %s653_s0 = inlined_call_operand.hbm [shape: f32[2,16,32], index: 0, kind: input, shape index: {}]   ;;  %s654_s1 = inlined_call_operand.hbm [shape: f32[2,1,32], index: 1, kind: output, shape index: {}]  }
   0x1   :  { %8 = vsyncpa [#allocation3 + $0x1], 0 }
   0x2   :  { %9 = vsyncpa [#allocation4], 0 }
   0x3   :  { %11 = vsyncpa [#allocation4 + $0x1], 0  ;;  %s476_s6 = smov 0   ;;  %s478_s7 = smov 0  }
   0x4   :  { %s480_s8 = smov 0   ;;  %s482_s9 = smov 0  }
   0x5   :  { %s484_s10 = smov 0   ;;  %s486_s11 = smov 0  }
   0x6 LB: > { %s269_s12 = sadd.s32 4294967295, %s459_s11   ;;  %s270_s13 = sadd.s32 4294967294, %s459_s11   ;;  %s459_s11 = sphi %s486_s11, %s17_s11   ;;  %s455_s10 = sphi %s484_s10, %s669_s10   ;;  %s451_s9 = sphi %s482_s9, %s668_s9   ;;  %s447_s8 = sphi %s480_s8, %s667_s8   ;;  %s443_s7 = sphi %s478_s7, %s666_s7   ;;  %s439_s6 = sphi %s476_s6, %s665_s6  }
   0x7   : > { %s29_s14 = sadd.s32 1, %s455_s10  ;;  %s38_s15 = sadd.s32 1, %s447_s8 }
   0x8   : > { %p31_p0 = scmp.ge.s32.totalorder %s29_s14, 2  ;;  %p45_p1 = scmp.ne.s32.totalorder %s447_s8, %s443_s7 }
   0x9   : > { %p46_p2 = scmp.eq.s32.totalorder %s459_s11, 0  ;;  %p51_p3 = scmp.ne.s32.totalorder %s443_s7, %s439_s6 }
   0xa   : > { %s671_s14 = smov (%p31_p0, %s29_s14), 0  ;;  %p52_p5 = scmp.eq.s32.totalorder %s269_s12, 0 }
   0xb   : > { %p517_p4 = por %p46_p2, %p45_p1  ;;  %s33_s17 = ssub.s32 %s455_s10, %s671_s14 }
   0xc   : > { %p75_p6 = scmp.eq.s32.totalorder %s269_s12, 1  ;;  %p36_p7 = scmp.eq.s32.totalorder %s33_s17, 0 }
   0xd   : > { %p523_p8 = por %p52_p5, %p51_p3  ;;  %p81_p10 = scmp.eq.s32.totalorder %s270_s13, 1 }
   0xe   : > { %p527_p9 = por %p75_p6, %p45_p1  ;;  %p294_p13 = scmp.lt.s32.totalorder %s459_s11, 2 }
   0xf   : > { %s532_s20 = scalar_select %p36_p7, %s447_s8, %s38_s15  }
  0x10   : > { %s658_s19 = scalar_select %p527_p9, 1, 0 }
  0x11   : > { %p534_p11 = por %p81_p10, %p51_p3  ;;  %s101_s22 = sand.u32 1, %s447_s8  }
  0x12   : > { %s273_s23 = sshll.u32 %s101_s22, 4  ;;  %s281_s24 = sshll.u32 %s455_s10, 8 }
  0x13   : > { %s659_s21 = scalar_select %p534_p11, 1, 0 }
  0x14   : > { %s545_s27 = scalar_lea.hbm %s653_s0, %s281_s24  ;;  %s105_s28 = scalar_lea.vmem [#allocation2], %s273_s23 }
  0x15   : > { %s114_s29 = sshll.u32 %s105_s28, 4  ;;  %p551_p0 = pnand %p294_p13, %p517_p4  ;;  %s547_s29 = int_to_ptr.vmem [resolvable:$true] %s114_s29 }
  0x16   : > { %s556_s2 = scalar_lea.sflag [#allocation3], %s101_s22  ;;  %s347_s3 = scalar_lea.hbm %s545_s27, 256 }
  0x17   : > { %p348_p2 = scmp.ne.s32.totalorder %s545_s27, %s347_s3  ;;  %p349_p3 = pneg %p551_p0 }
  0x18   : > { %s352_s12 = scalar_lea.hbm %s653_s0, 512  ;;  %p353_p4 = scmp.lt.u32.totalorder %s545_s27, %s653_s0 }
  0x19   : > { %p350_p5 = pnand %p349_p3, %p348_p2  ;;  %p354_p7 = scmp.lt.u32.totalorder %s352_s12, %s347_s3 }
  0x1a   : > { %p356_p13 = scmp.lt.u32.totalorder %s347_s3, %s545_s27 }
  0x1b   : > { %p351_p6 = pneg %p350_p5  ;;  %p355_p10 = por %p354_p7, %p353_p4 }
  0x1d   : > { %p357_p12 = por %p356_p13, %p355_p10 }
  0x1f   : > { %p358_p1 = pnand %p357_p12, %p351_p6 }
  0x21   : > { %361 = shalt.err (!%p358_p1)
}
  0x22   : > { %s362_s16 = scalar_lea.vmem %s547_s29, 256  ;;  %s461_s17 = smov [#allocation2]  }
  0x23   : > { %p363_p2 = scmp.ne.s32.totalorder %s547_s29, %s362_s16  ;;  %s367_s22 = sshll.u32 %s461_s17, 4  ;;  %s368_s22 = int_to_ptr.vmem [resolvable:$false] %s367_s22 }
  0x24   : > { %s369_s23 = scalar_lea.vmem %s368_s22, 512  ;;  %p370_p9 = scmp.lt.s32.totalorder %s547_s29, %s368_s22 }
  0x25   : > { %p365_p5 = pnand %p363_p2, %p349_p3  ;;  %p371_p4 = scmp.lt.s32.totalorder %s369_s23, %s362_s16 }
  0x27   : > { %p366_p11 = pneg %p365_p5  ;;  %p372_p7 = por %p371_p4, %p370_p9 }
  0x29   : > { %p373_p10 = pnand %p372_p7, %p366_p11 }
  0x2b   : > { %376 = shalt.err (!%p373_p10)
}
  0x2c   : > { %s462_s24 = smov 128   ;;  %s463_s25 = smov 8  }
  0x2d   : > { %289 = dma.hbm_to_vmem [thread:$0]  (!%p551_p0), %s545_s27, 256, %s547_s29, %s556_s2, %s462_s24, %s462_s24, %s463_s25  }
  0x2e   : > { %p122_p12 = scmp.lt.s32.totalorder %s459_s11, 3  ;;  %p661_p1 = scmp.ge.s32.totalorder %s459_s11, 1 }
  0x30   : > { %p123_p3 = pnand %p661_p1, %p122_p12 }
  0x31   : > { %s588_s26 = sand.u32 (!%p123_p3), 1, %s443_s7  }
  0x32   : > { %126 = sbr.rel (%p123_p3) target bundleno = 101 (0x65), region = 24  ;;  %s277_s28 = sshll.u32 (!%p123_p3), %s588_s26, 4 }
  0x33   : > { %s129_s3 = scalar_lea.sflag (!%p123_p3), [#allocation3], %s588_s26  ;;  %s132_s4 = scalar_lea.vmem (!%p123_p3), [#allocation2], %s277_s28 }
  0x39   : > { %430 = dma.done.wait (%p523_p8), %s129_s3, 256  }
  0x3a   : > { %432 = vsyncadd (%p523_p8), %s129_s3, 4294967040  ;;  %vm155_vm0 = vcmask 253952   ;;  %s149_s27 = scalar_lea.vmem [#allocation5], %s588_s26  ;;  %v464_v0 = vmov 0.0   ;;  %vm160_vm1 = vcmask 261120   ;;  %v158_v1 = vld [vmem:[%s132_s4] sm:$0xff] }
  0x3b   : > { %156 = vst.msk [vmem:[%s149_s27] sm:$0x1] %vm155_vm0, %v464_v0  ;;  %v159_v2 = vld [vmem:[%s132_s4 + $0x8] sm:$0xff]  ;;  %v161_v3 = vsel %vm160_vm1, %v158_v1, 0.0  ;;  %s278_s18 = sshll.u32 %s451_s9, 4  ;;  %s192_s29 = sshll.u32 %s149_s27, 4  ;;  %s605_s29 = int_to_ptr.vmem [resolvable:$true] %s192_s29 }
  0x3c   : > { %v162_v4 = vsel %vm160_vm1, %v159_v2, 0.0  ;;  %s603_s5 = scalar_lea.hbm %s654_s1, %s278_s18  ;;  %s180_s12 = scalar_lea.sflag [#allocation4], %s588_s26 }
  0x3d   : > { %v163_v5 = vadd.f32 %v162_v4, %v161_v3  ;;  %s377_s13 = scalar_lea.vmem %s605_s29, 16  ;;  %p662_p9 = scmp.ne.s32.totalorder %s658_s19, 0 }
  0x3e   : > { %p378_p8 = scmp.ne.s32.totalorder %s605_s29, %s377_s13  ;;  %s465_s9 = smov [#allocation5]  }
  0x3f   : > { %v164_v6 = vrot.slane %v163_v5, 4  ;;  %s381_s15 = sshll.u32 %s465_s9, 4  ;;  %s382_s15 = int_to_ptr.vmem [resolvable:$false] %s381_s15 }
  0x40   : > { %p379_p11 = pnand %p378_p8, %p662_p9  ;;  %s383_s16 = scalar_lea.vmem %s382_s15, 32 }
  0x41   : > { %v165_v7 = vadd.f32 %v164_v6, %v163_v5  ;;  %p384_p6 = scmp.lt.s32.totalorder %s605_s29, %s382_s15  ;;  %p385_p13 = scmp.lt.s32.totalorder %s383_s16, %s377_s13 }
  0x42   : > { %v157_v11 = vld [vmem:[%s149_s27] sm:$0x1]  ;;  %p380_p0 = pneg %p379_p11 }
  0x43   : > { %v166_v8 = vrot.slane %v165_v7, 2  ;;  %p386_p2 = por %p385_p13, %p384_p6 }
  0x45   : > { %v167_v9 = vadd.f32 %v166_v8, %v165_v7  ;;  %p387_p5 = pnand %p386_p2, %p380_p0 }
  0x47   : > { %v168_v10 = vrot.slane %v167_v9, 1 }
  0x49   : > { %v169_v12 = vadd.f32 %v168_v10, %v167_v9 }
  0x4b   : > { %v170_v13 = vadd.f32 %v169_v12, %v157_v11 }
  0x4d   : > { %172 = vst.msk [vmem:[%s149_s27] sm:$0x1] %vm155_vm0, %v170_v13 }
  0x54   : > { %v176_v14 = vld [vmem:[%s149_s27] sm:$0x1] }
  0x55   : > { %v177_v15 = vmul.f32 0.0625, %v176_v14 }
  0x57   : > { %178 = vst.msk [vmem:[%s149_s27] sm:$0x1] %vm155_vm0, %v177_v15 }
  0x58   : > { %390 = shalt.err (!%p387_p5)
}
  0x59   : > { %s391_s17 = scalar_lea.hbm %s603_s5, 16  ;;  %s395_s24 = scalar_lea.hbm %s654_s1, 32 }
  0x5a   : > { %p392_p4 = scmp.ne.s32.totalorder %s603_s5, %s391_s17  ;;  %p396_p12 = scmp.lt.u32.totalorder %s603_s5, %s654_s1 }
  0x5b   : > { %p397_p1 = scmp.lt.u32.totalorder %s395_s24, %s391_s17  ;;  %p399_p8 = scmp.lt.u32.totalorder %s391_s17, %s603_s5 }
  0x5c   : > { %p393_p7 = pnand %p392_p4, %p662_p9 }
  0x5d   : > { %p398_p3 = por %p397_p1, %p396_p12 }
  0x5e   : > { %p394_p10 = pneg %p393_p7 }
  0x5f   : > { %p400_p11 = por %p399_p8, %p398_p3 }
  0x61   : > { %p401_p0 = pnand %p400_p11, %p394_p10 }
  0x63   : > { %404 = shalt.err (!%p401_p0)
}
  0x64   : > { %284 = dma.vmem_to_hbm [thread:$0]  (%p662_p9), %s605_s29, 16, %s603_s5, %s180_s12  }
  0x65 PF: > { %s204_s28 = sand.u32 1, %s439_s6   ;;  %p663_p6 = scmp.ne.s32.totalorder %s659_s21, 0 }
  0x66   : > { %p664_p13 = scmp.ge.s32.totalorder %s459_s11, 2  ;;  %s205_s3 = scalar_lea.sflag [#allocation4], %s204_s28 }
  0x68   : > { %p291_p2 = pnand %p664_p13, %p663_p6 }
  0x6a   : > { %434 = dma.done.wait (!%p291_p2), %s205_s3, 16  }
  0x6b   : > { %436 = vsyncadd (!%p291_p2), %s205_s3, 4294967280  ;;  %s17_s11 = sadd.s32 1, %s459_s11   ;;  %s665_s6 = smov %s443_s7 }
  0x6c   : > { %p14_p5 = scmp.ge.s32.totalorder %s17_s11, 4   ;;  %s666_s7 = smov %s447_s8 }
  0x6d   : > { %s667_s8 = smov %s532_s20  ;;  %s668_s9 = smov %s455_s10 }
  0x6e   : > { %s669_s10 = smov %s671_s14  ;;  %16 = sbr.rel (!%p14_p5) target bundleno = 6 (0x6), region = 77 }
  0x75   :  { %209 = vsyncpa [#allocation3], 1 }
  0x76   :  { %211 = vsyncpa [#allocation3 + $0x1], 1 }
  0x77   :  { %212 = vsyncpa [#allocation4], 1 }
  0x78   :  { %214 = vsyncpa [#allocation4 + $0x1], 1 }

// kernel: sub.17
= control target key start
LH: loop header
LB: loop body
LE: loop exit
PB: predicated region body
PF: predicated region fallthrough
CT: control target
= control target key end

     0   :  { %vm7_vm0 = vcmask 64512   ;;  %vm13_vm1 = vcmask 130112   ;;  %s39_s0 = inlined_call_operand.vmem [shape: f32[2,8], index: 0, kind: input, shape index: {}]   ;;  %s40_s1 = inlined_call_operand.vmem [shape: f32[16], index: 1, kind: output, shape index: {}]  }
   0x1   :  { %v4_v0 = vld [vmem:[%s39_s0] sm:$0x3]  ;;  %s22_s0 = smov 8  }
   0x2   :  { %5 = vst [vmem:[#allocation1] sm:$0x3] %v4_v0 }
   0x9   :  { %v10_v1 = vld [vmem:[#allocation1 + $0x1] sm:$0x1]   ;;  %v6_v2 = vld [vmem:[#allocation1] sm:$0x1]  }
   0xa   :  { %11 = vrot.lane.b32.xlu0 %v10_v1, %s22_s0  ;;  %8 = vst.msk [vmem:[#allocation0] sm:$0x1] %vm7_vm0, %v6_v2  }
  0x7c   :  { %v12_v3 = vpop.permute.xlu0 %11  }
  0x7d   :  { %14 = vst.msk [vmem:[#allocation0] sm:$0x1] %vm13_vm1, %v12_v3  }
  0x84   :  { %v18_v4 = vld [vmem:[#allocation0] sm:$0x1] }
  0x85   :  { %20 = vst [vmem:[%s40_s1] sm:$0x1] %v18_v4 }

// kernel: multi_task_forward.3
= control target key start
LH: loop header
LB: loop body
LE: loop exit
PB: predicated region body
PF: predicated region fallthrough
CT: control target
= control target key end

     0   :  { %13 = vsyncpa [#allocation3], 0  ;;  %s1709_s0 = inlined_call_operand.hbm [shape: bf16[2,16,32], index: 0, kind: input, shape index: {}]   ;;  %s1710_s1 = inlined_call_operand.hbm [shape: bf16[8,32], index: 1, kind: input, shape index: {}]   ;;  %s1711_s2 = inlined_call_operand.hbm [shape: bf16[32,160], index: 2, kind: input, shape index: {}]   ;;  %s1712_s3 = inlined_call_operand.hbm [shape: f32[1,160], index: 3, kind: input, shape index: {}]   ;;  %s1713_s4 = inlined_call_operand.hbm [shape: bf16[32,4], index: 4, kind: input, shape index: {}]   ;;  %s1714_s5 = inlined_call_operand.hbm [shape: f32[1,4], index: 5, kind: input, shape index: {}]   ;;  %s1715_s6 = inlined_call_operand.hbm [shape: f32[2,8,128], index: 6, kind: output, shape index: {0}]   ;;  %s1716_s7 = inlined_call_operand.hbm [shape: f32[2,8,16], index: 7, kind: output, shape index: {1}]  }
   0x1   :  { %15 = vsyncpa [#allocation3 + $0x1], 0 }
   0x2   :  { %16 = vsyncpa [#allocation6], 0 }
   0x3   :  { %17 = vsyncpa [#allocation9], 0 }
   0x4   :  { %18 = vsyncpa [#allocation12], 0 }
   0x5   :  { %19 = vsyncpa [#allocation4], 0 }
   0x6   :  { %21 = vsyncpa [#allocation4 + $0x1], 0 }
   0x7   :  { %22 = vsyncpa [#allocation15], 0 }
   0x8   :  { %24 = vsyncpa [#allocation15 + $0x1], 0  ;;  %s1367_s24 = smov 0   ;;  %s1369_s25 = smov 0  }
   0x9   :  { %s1371_s26 = smov 0   ;;  %s1373_s27 = smov 0  }
   0xa LB: > { %s1311_s28 = smov [#allocation5]   ;;  %s1388_s30 = sadd.s32 4294967295, %s1309_s27   ;;  %s1309_s27 = sphi %s1373_s27, %s1743_s27   ;;  %s1305_s26 = sphi %s1371_s26, %s1742_s26   ;;  %s1301_s25 = sphi %s1369_s25, %s1741_s25   ;;  %s1297_s24 = sphi %s1367_s24, %s1740_s24  }
   0xb   : > { %s231_s29 = sshll.u32 %s1311_s28, 4  ;;  %p836_p0 = scmp.ge.s32.totalorder %s1309_s27, 1  ;;  %s232_s29 = int_to_ptr.vmem [resolvable:$true] %s231_s29 }
   0xc   : > { %p1717_p1 = scmp.eq.s32.totalorder %s1388_s30, 0  ;;  %p218_p2 = scmp.lt.s32.totalorder %s1309_s27, 3 }
   0xd   : > { %s1312_s9 = smov [#allocation8]   ;;  %s1313_s11 = smov [#allocation7]  }
   0xe   : > { %p1393_p3 = pnand %p836_p0, %p218_p2  ;;  %s255_s10 = sshll.u32 %s1312_s9, 4  ;;  %s1400_s10 = int_to_ptr.vmem [resolvable:$true] %s255_s10 }
   0xf   : > { %s241_s12 = sshll.u32 %s1313_s11, 4  ;;  %s1029_s16 = scalar_lea.hbm %s1710_s1, 64  ;;  %s1408_s12 = int_to_ptr.vmem [resolvable:$true] %s241_s12 }
  0x10   : > { %s1721_s8 = scalar_select %p1393_p3, 1, 0 }
  0x11   : > { %p928_p5 = pneg %p1393_p3  ;;  %p1030_p7 = scmp.ne.s32.totalorder %s1710_s1, %s1029_s16 }
  0x12   : > { %p1036_p11 = scmp.lt.u32.totalorder %s1029_s16, %s1710_s1 }
  0x13   : > { %p1404_p6 = pnand %p928_p5, %p1717_p1 }
  0x15   : > { %p1418_p8 = pneg %p1404_p6 }
  0x17   : > { %p1032_p9 = pnand %p1418_p8, %p1030_p7 }
  0x19   : > { %p1033_p10 = pneg %p1032_p9 }
  0x1b   : > { %p1038_p12 = pnand %p1036_p11, %p1033_p10 }
  0x1d   : > { %1041 = shalt.err (!%p1038_p12)
}
  0x1e   : > { %s1042_s22 = scalar_lea.vmem %s232_s29, 64  ;;  %p1050_p5 = scmp.lt.s32.totalorder %s232_s29, %s232_s29 }
  0x1f   : > { %p1043_p13 = scmp.ne.s32.totalorder %s232_s29, %s1042_s22  ;;  %p1051_p4 = scmp.lt.s32.totalorder %s1042_s22, %s1042_s22 }
  0x21   : > { %p1045_p0 = pnand %p1043_p13, %p1418_p8  ;;  %p1052_p1 = por %p1051_p4, %p1050_p5 }
  0x23   : > { %p1046_p2 = pneg %p1045_p0 }
  0x25   : > { %p1053_p3 = pnand %p1052_p1, %p1046_p2 }
  0x27   : > { %1056 = shalt.err (!%p1053_p3)
}
  0x28   : > { %931 = dma.hbm_to_vmem [thread:$0]  (!%p1404_p6), %s1710_s1, 64, %s232_s29, [#allocation6]  }
  0x29   : > { %s1057_s14 = scalar_lea.hbm %s1712_s3, 32 }
  0x2a   : > { %p1058_p7 = scmp.ne.s32.totalorder %s1712_s3, %s1057_s14  ;;  %p1064_p1 = scmp.lt.u32.totalorder %s1057_s14, %s1712_s3 }
  0x2c   : > { %p1060_p9 = pnand %p1058_p7, %p1418_p8 }
  0x2e   : > { %p1061_p4 = pneg %p1060_p9 }
  0x30   : > { %p1066_p3 = pnand %p1064_p1, %p1061_p4 }
  0x32   : > { %1069 = shalt.err (!%p1066_p3)
}
  0x33   : > { %s1070_s29 = scalar_lea.vmem %s1400_s10, 32  ;;  %p1078_p13 = scmp.lt.s32.totalorder %s1400_s10, %s1400_s10 }
  0x34   : > { %p1071_p10 = scmp.ne.s32.totalorder %s1400_s10, %s1070_s29  ;;  %p1079_p0 = scmp.lt.s32.totalorder %s1070_s29, %s1070_s29 }
  0x36   : > { %p1073_p11 = pnand %p1071_p10, %p1418_p8  ;;  %p1080_p2 = por %p1079_p0, %p1078_p13 }
  0x38   : > { %p1074_p12 = pneg %p1073_p11 }
  0x3a   : > { %p1081_p5 = pnand %p1080_p2, %p1074_p12 }
  0x3c   : > { %1084 = shalt.err (!%p1081_p5)
}
  0x3d   : > { %937 = dma.hbm_to_vmem [thread:$0]  (!%p1404_p6), %s1712_s3, 32, %s1400_s10, [#allocation9]  }
  0x3e   : > { %s1085_s28 = scalar_lea.hbm %s1711_s2, 512 }
  0x3f   : > { %p1086_p7 = scmp.ne.s32.totalorder %s1711_s2, %s1085_s28  ;;  %p1092_p1 = scmp.lt.u32.totalorder %s1085_s28, %s1711_s2 }
  0x41   : > { %p1088_p9 = pnand %p1086_p7, %p1418_p8 }
  0x43   : > { %p1089_p4 = pneg %p1088_p9 }
  0x45   : > { %p1094_p3 = pnand %p1092_p1, %p1089_p4 }
  0x47   : > { %1097 = shalt.err (!%p1094_p3)
}
  0x48   : > { %s1098_s10 = scalar_lea.vmem %s1408_s12, 512  ;;  %p1106_p13 = scmp.lt.s32.totalorder %s1408_s12, %s1408_s12 }
  0x49   : > { %p1099_p10 = scmp.ne.s32.totalorder %s1408_s12, %s1098_s10  ;;  %p1107_p0 = scmp.lt.s32.totalorder %s1098_s10, %s1098_s10 }
  0x4b   : > { %p1101_p11 = pnand %p1099_p10, %p1418_p8  ;;  %p1108_p2 = por %p1107_p0, %p1106_p13 }
  0x4d   : > { %p1102_p12 = pneg %p1101_p11 }
  0x4f   : > { %p1109_p5 = pnand %p1108_p2, %p1102_p12 }
  0x51   : > { %1112 = shalt.err (!%p1109_p5)
}
  0x52   : > { %s1314_s16 = smov 128   ;;  %s1315_s17 = smov 8  }
  0x53   : > { %934 = dma.hbm_to_vmem [thread:$0]  (!%p1404_p6), %s1711_s2, 512, %s1408_s12, [#allocation6], %s1314_s16, %s1314_s16, %s1315_s17  }
  0x54   : > { %s1316_s20 = smov [#allocation10]   ;;  %s1113_s28 = scalar_lea.hbm %s1713_s4, 256 }
  0x55   : > { %s265_s21 = sshll.u32 %s1316_s20, 4  ;;  %p1114_p7 = scmp.ne.s32.totalorder %s1713_s4, %s1113_s28  ;;  %s266_s21 = int_to_ptr.vmem [resolvable:$true] %s265_s21 }
  0x56   : > { %p1120_p1 = scmp.lt.u32.totalorder %s1113_s28, %s1713_s4 }
  0x57   : > { %p1116_p9 = pnand %p1114_p7, %p1418_p8 }
  0x59   : > { %p1117_p4 = pneg %p1116_p9 }
  0x5b   : > { %p1122_p3 = pnand %p1120_p1, %p1117_p4 }
  0x5d   : > { %1125 = shalt.err (!%p1122_p3)
}
  0x5e   : > { %s1126_s12 = scalar_lea.vmem %s266_s21, 256  ;;  %p1134_p13 = scmp.lt.s32.totalorder %s266_s21, %s266_s21 }
  0x5f   : > { %p1127_p10 = scmp.ne.s32.totalorder %s266_s21, %s1126_s12  ;;  %p1135_p0 = scmp.lt.s32.totalorder %s1126_s12, %s1126_s12 }
  0x61   : > { %p1129_p11 = pnand %p1127_p10, %p1418_p8  ;;  %p1136_p2 = por %p1135_p0, %p1134_p13 }
  0x63   : > { %p1130_p12 = pneg %p1129_p11 }
  0x65   : > { %p1137_p5 = pnand %p1136_p2, %p1130_p12 }
  0x67   : > { %1140 = shalt.err (!%p1137_p5)
}
  0x68   : > { %s1719_s10 = smov 64   ;;  %s1318_s16 = smov 4  }
  0x69   : > { %940 = dma.hbm_to_vmem [thread:$0]  (!%p1404_p6), %s1713_s4, 256, %s266_s21, [#allocation9], %s1719_s10, %s1719_s10, %s1318_s16  }
  0x6a   : > { %s1319_s29 = smov [#allocation11]   ;;  %s1141_s28 = scalar_lea.hbm %s1714_s5, 16 }
  0x6b   : > { %s279_s20 = sshll.u32 %s1319_s29, 4  ;;  %p1142_p7 = scmp.ne.s32.totalorder %s1714_s5, %s1141_s28  ;;  %s280_s20 = int_to_ptr.vmem [resolvable:$true] %s279_s20 }
  0x6c   : > { %p1148_p1 = scmp.lt.u32.totalorder %s1141_s28, %s1714_s5 }
  0x6d   : > { %p1144_p9 = pnand %p1142_p7, %p1418_p8 }
  0x6f   : > { %p1145_p4 = pneg %p1144_p9 }
  0x71   : > { %p1150_p3 = pnand %p1148_p1, %p1145_p4 }
  0x73   : > { %1153 = shalt.err (!%p1150_p3)
}
  0x74   : > { %s1154_s21 = scalar_lea.vmem %s280_s20, 16  ;;  %s1161_s12 = scalar_lea.vmem %s280_s20, 32 }
  0x75   : > { %p1155_p10 = scmp.ne.s32.totalorder %s280_s20, %s1154_s21  ;;  %p1162_p13 = scmp.lt.s32.totalorder %s280_s20, %s280_s20 }
  0x76   : > { %p1163_p0 = scmp.lt.s32.totalorder %s1161_s12, %s1154_s21 }
  0x77   : > { %p1157_p11 = pnand %p1155_p10, %p1418_p8 }
  0x78   : > { %p1164_p2 = por %p1163_p0, %p1162_p13 }
  0x79   : > { %p1158_p12 = pneg %p1157_p11 }
  0x7b   : > { %p1165_p5 = pnand %p1164_p2, %p1158_p12 }
  0x7d   : > { %1168 = shalt.err (!%p1165_p5)
}
  0x7e   : > { %943 = dma.hbm_to_vmem [thread:$0]  (!%p1404_p6), %s1714_s5, 16, %s280_s20, [#allocation12]  }
  0x7f   : > { %s835_s19 = sadd.s32 4294967294, %s1309_s27   ;;  %s1521_s13 = sadd.s32 1, %s1309_s27  }
  0x80   : > { %s37_s29 = sadd.s32 1, %s1305_s26  ;;  %s34_s22 = ssub.s32 %s1309_s27, %s1521_s13 }
  0x81   : > { %p44_p8 = scmp.ne.s32.totalorder %s1305_s26, %s1301_s25  ;;  %p35_p7 = scmp.eq.s32.totalorder %s34_s22, 0 }
  0x82   : > { %p45_p9 = scmp.eq.s32.totalorder %s1309_s27, 0  ;;  %p50_p4 = scmp.ne.s32.totalorder %s1301_s25, %s1297_s24 }
  0x83   : > { %p179_p1 = scmp.eq.s32.totalorder %s1388_s30, 1  ;;  %p1724_p10 = scmp.eq.s32.totalorder %s1388_s30, 0 }
  0x84   : > { %s1533_s23 = scalar_select %p35_p7, %s1305_s26, %s37_s29  }
  0x85   : > { %p46_p3 = por %p45_p9, %p44_p8  ;;  %p1537_p11 = por %p1724_p10, %p50_p4 }
  0x86   : > { %p1541_p6 = por %p179_p1, %p44_p8  ;;  %p185_p12 = scmp.eq.s32.totalorder %s835_s19, 1 }
  0x87   : > { %p960_p13 = scmp.lt.s32.totalorder %s1309_s27, 2  ;;  %s290_s9 = sand.u32 1, %s1305_s26  }
  0x88   : > { %s1726_s20 = scalar_select %p1541_p6, 1, 0 }
  0x89   : > { %p1547_p0 = por %p185_p12, %p50_p4  ;;  %s843_s14 = sshll.u32 %s290_s9, 3 }
  0x8a   : > { %s874_s15 = sshll.u32 %s1309_s27, 7  ;;  %s294_s18 = scalar_lea.vmem [#allocation2], %s843_s14 }
  0x8b   : > { %s1727_s11 = scalar_select %p1547_p0, 1, 0 }
  0x8c   : > { %s1555_s17 = scalar_lea.hbm %s1709_s0, %s874_s15  ;;  %s301_s29 = sshll.u32 %s294_s18, 4  ;;  %s1561_s29 = int_to_ptr.vmem [resolvable:$true] %s301_s29 }
  0x8d   : > { %p1557_p2 = pnand %p960_p13, %p46_p3  ;;  %s1563_s22 = scalar_lea.sflag [#allocation3], %s290_s9 }
  0x8e   : > { %s1169_s10 = scalar_lea.hbm %s1555_s17, 128  ;;  %s1174_s21 = scalar_lea.hbm %s1709_s0, 256 }
  0x8f   : > { %p1170_p5 = scmp.ne.s32.totalorder %s1555_s17, %s1169_s10  ;;  %p1171_p8 = pneg %p1557_p2 }
  0x90   : > { %p1175_p4 = scmp.lt.u32.totalorder %s1555_s17, %s1709_s0  ;;  %p1176_p1 = scmp.lt.u32.totalorder %s1174_s21, %s1169_s10 }
  0x91   : > { %p1172_p7 = pnand %p1171_p8, %p1170_p5  ;;  %p1178_p10 = scmp.lt.u32.totalorder %s1169_s10, %s1555_s17 }
  0x92   : > { %p1177_p3 = por %p1176_p1, %p1175_p4 }
  0x93   : > { %p1173_p9 = pneg %p1172_p7 }
  0x94   : > { %p1179_p12 = por %p1178_p10, %p1177_p3 }
  0x96   : > { %p1180_p13 = pnand %p1179_p12, %p1173_p9 }
  0x98   : > { %1183 = shalt.err (!%p1180_p13)
}
  0x99   : > { %s1184_s9 = scalar_lea.vmem %s1561_s29, 128  ;;  %s1320_s14 = smov [#allocation2]  }
  0x9a   : > { %p1185_p5 = scmp.ne.s32.totalorder %s1561_s29, %s1184_s9  ;;  %s1189_s15 = sshll.u32 %s1320_s14, 4  ;;  %s1190_s15 = int_to_ptr.vmem [resolvable:$false] %s1189_s15 }
  0x9b   : > { %s1191_s12 = scalar_lea.vmem %s1190_s15, 256  ;;  %p1192_p6 = scmp.lt.s32.totalorder %s1561_s29, %s1190_s15 }
  0x9c   : > { %p1187_p7 = pnand %p1185_p5, %p1171_p8  ;;  %p1193_p4 = scmp.lt.s32.totalorder %s1191_s12, %s1184_s9 }
  0x9e   : > { %p1188_p0 = pneg %p1187_p7  ;;  %p1194_p1 = por %p1193_p4, %p1192_p6 }
  0xa0   : > { %p1195_p3 = pnand %p1194_p1, %p1188_p0 }
  0xa2   : > { %1198 = shalt.err (!%p1195_p3)
}
  0xa3   : > { %s1729_s10 = smov 64   ;;  %p1730_p8 = scmp.ne.s32.totalorder %s1721_s8, 0 }
  0xa4   : > { %947 = dma.hbm_to_vmem [thread:$0]  (!%p1557_p2), %s1555_s17, 128, %s1561_s29, %s1563_s22, %s1729_s10, %s1729_s10, %s1318_s16  }
  0xa5   : > { %313 = sbr.rel (%p1730_p8) target bundleno = 1529 (0x5f9), region = 44  ;;  %s1597_s21 = sand.u32 (!%p1730_p8), 1, %s1301_s25  }
  0xa6   : > { %s1600_s18 = sshll.u32 (!%p1730_p8), %s1597_s21, 3  ;;  %s316_s19 = scalar_lea.sflag (!%p1730_p8), [#allocation3], %s1597_s21 }
  0xa7   : > { %s319_s9 = scalar_lea.vmem (!%p1730_p8), [#allocation2], %s1600_s18 }
  0xac   : > { %1272 = dma.done.wait (%p1537_p11), %s316_s19, 128  }
  0xad   : > { %1274 = vsyncadd (%p1537_p11), %s316_s19, 4294967168  ;;  %p1731_p6 = scmp.eq.s32.totalorder %s1388_s30, 0 }
  0xaf   : > { %1276 = dma.done.wait (%p1731_p6), [#allocation6], 576   ;;  %p1732_p0 = pmov %p1731_p6 }
  0xb1   : > { %1278 = vsyncadd (%p1732_p0), [#allocation6], 4294966720  ;;  %p1733_p2 = pmov %p1732_p0 }
  0xb2   : > { %p1734_p9 = pmov %p1732_p0 }
  0xb3   : > { %1280 = dma.done.wait (%p1733_p2), [#allocation9], 288  }
  0xb4   : > { %1282 = vsyncadd (%p1734_p9), [#allocation9], 4294967008  ;;  %p1735_p10 = pmov %p1732_p0 }
  0xb5   : > { %p1736_p12 = pmov %p1732_p0 }
  0xb6   : > { %1284 = dma.done.wait (%p1735_p10), [#allocation12], 16  }
  0xb7   : > { %1286 = vsyncadd (%p1736_p12), [#allocation12], 4294967280  ;;  %v1321_v0 = vmov 0.0   ;;  %vm1322_vm0 = vmmov 0   ;;  %vm384_vm1 = vcmask 261120   ;;  %v1012_v1 = vld [vmem:[%s319_s9] sm:$0xff]   ;;  %v496_v30 = vlaneseq }
  0xb8   : > { %882 = vmatprep.subr.bf16.mxu0 %v1321_v0  ;;  %884 = vmatprep.mubr.msk.bf16.mxu0 %vm1322_vm0, %v1321_v0  ;;  %v389_v2 = vsel %vm384_vm1, %v1012_v1, 0  ;;  %v378_v3 = vld [vmem:[#allocation5] sm:$0xf]  ;;  %vm431_vm2 = vcmask 130048   ;;  %v1015_v14 = vld [vmem:[#allocation7 + $0x4] ss:$8 sps:$4 sm:$0xff]  }
  0xb9   : > { %888 = vmatprep.subr.bf16.mxu1 %v1321_v0  ;;  %890 = vmatprep.mubr.msk.bf16.mxu1 %vm1322_vm0, %v1321_v0  ;;  %v1013_v18 = vld [vmem:[#allocation7] ss:$8 sps:$4 sm:$0xff]   ;;  %v1018_v20 = vld [vmem:[#allocation7 + $0x14] ss:$8 sps:$4 sm:$0xff]   ;;  %s374_s8 = scalar_lea.vmem [#allocation14], %s1600_s18  ;;  %v1323_v22 = vmov 0  }
  0xba   : > { %889 = vmatpush3.bf16.msra.mxu1 %v1012_v1  ;;  %883 = vmatpush3.bf16.xpose.msra.mxu0 %v389_v2  ;;  %v1016_v21 = vld [vmem:[#allocation7 + $0x10] ss:$8 sps:$4 sm:$0xff]   ;;  %v1019_v28 = vld [vmem:[#allocation10] sm:$0xff]   ;;  %v497_v31 = vshrl.u32 %v496_v30, 7  ;;  %v494_v33 = vld [vmem:[#allocation8] sm:$0x3] }
  0xbb   : > { %894 = vmatprep.subr.bf16.mxu0 %v1321_v0  ;;  %529 = vmatprep.subr.bf16.mxu1 %v1015_v14  ;;  %v1020_v29 = vld [vmem:[#allocation10 + $0x8] sm:$0xff]   ;;  %v863_v42 = vld [vmem:[#allocation11] ss:$0 sm:$0xff]  ;;  %s870_s16 = sshll.u32 %s1388_s30, 7  ;;  %s685_s22 = sshll.u32 %s374_s8, 4  ;;  %s686_s22 = int_to_ptr.vmem [resolvable:$true] %s685_s22 }
  0xbc   : > { %v502_v32 = vsub.s32 1, %v497_v31  ;;  %s1637_s29 = scalar_lea.hbm %s1716_s7, %s870_s16  ;;  %s659_s14 = scalar_lea.sflag [#allocation15], %s1597_s21 }
  0xbd   : > { %s1199_s15 = scalar_lea.vmem %s686_s22, 128  ;;  %p1737_p13 = scmp.ne.s32.totalorder %s1726_s20, 0 }
  0xbe   : > { %v503_v34 = vrot.slane %v494_v33, %v502_v32  ;;  %p1200_p11 = scmp.ne.s32.totalorder %s686_s22, %s1199_s15  ;;  %s1324_s12 = smov [#allocation14]  }
  0xbf   : > { %s1203_s10 = sshll.u32 %s1324_s12, 4  ;;  %s1204_s10 = int_to_ptr.vmem [resolvable:$false] %s1203_s10 }
  0xc0   : > { %p1201_p5 = pnand %p1200_p11, %p1737_p13  ;;  %s1205_s19 = scalar_lea.vmem %s1204_s10, 256 }
  0xc1   : > { %885 = vmatmul.mubr.msk.bf16.vlgmr.msra.gmra.mrb[0].mxu0 %vm384_vm1, %v378_v3  ;;  %p1206_p4 = scmp.lt.s32.totalorder %s686_s22, %s1204_s10  ;;  %p1207_p1 = scmp.lt.s32.totalorder %s1205_s19, %s1199_s15 }
  0xc2   : > { %898 = vmatprep.mubr.msk.bf16.mxu0 %vm1322_vm0, %v1321_v0  ;;  %895 = vmatpush3.bf16.msra.mxu0 %v1019_v28  ;;  %p1202_p7 = pneg %p1201_p5 }
  0xc3   : > { %896 = vmatprep.subr.bf16.mxu0 %v1321_v0  ;;  %p1208_p3 = por %p1207_p1, %p1206_p4 }
  0xc5   : > { %p1209_p8 = pnand %p1208_p3, %p1202_p7 }
  0xc6   : > { %897 = vmatpush3.bf16.msra.mxu0 %v1020_v29 }
 0x194   : > { %v425_v4 = vpop.f32.mrb[0].mxu0 }
 0x195   : > { %v886_v5 = vpop.f32.mrb[1].mxu0  ;;  %v432_v6 = vsel %vm431_vm2, %v425_v4, -inf }
 0x196   : > { %433 = vmax.xlane.f32.xlu0 %v432_v6  ;;  %v428_v7 = vpop.f32.mrb[2].mxu0 }
 0x197   : > { %v887_v8 = vpop.f32.mrb[3].mxu0 }
 0x223   : > { %v434_v9 = vpop.xlane.xlu0 %433 }
 0x224   : > { %v435_v10 = vsub.f32 %v425_v4, %v434_v9 }
 0x226   : > { %v436_v11 = vmul.f32 1.442695, %v435_v10 }
 0x228   : > { %1021 = vpow2.f32 %v436_v11 }
 0x232   : > { %v1022_v12 = vpop.eup %1021 }
 0x233   : > { %v438_v13 = vsel %vm431_vm2, %v1022_v12, 0.0 }
 0x234   : > { %439 = vadd.xlane.f32.xlu0 %v438_v13 }
 0x2c1   : > { %v440_v15 = vpop.xlane.xlu0 %439 }
 0x2c2   : > { %1023 = vrcp.f32 %v440_v15 }
 0x2cc   : > { %v1024_v16 = vpop.eup %1023 }
 0x2cd   : > { %v442_v17 = vmul.f32 %v1024_v16, %v1022_v12 }
 0x2cf   : > { %v444_v19 = vpack.c.bf16 %v442_v17, %v442_v17  ;;  %443 = vst.msk [vmem:[%s374_s8] sm:$0xff] %vm431_vm2, %v442_v17 }
 0x2d1   : > { %891 = vmatmul.mubr.msk.bf16.vlgmr.msra.gmra.mrb[0].mxu1 %vm431_vm2, %v444_v19 }
 0x2d2   : > { %530 = vmatpush1.bf16.msra.mxu1 %v1013_v18  ;;  %561 = vmatprep.mubr.bf16.mxu1 %v1323_v22 }
 0x2d3   : > { %531 = vmatprep.subr.bf16.mxu1 %v1018_v20 }
 0x2d6   : > { %532 = vmatpush1.bf16.msra.mxu1 %v1016_v21 }
 0x3a4   : > { %v483_v23 = vpop.f32.mrb[0].mxu1 }
 0x3a5   : > { %v489_v24 = vpack.c.bf16 %v483_v23, %v483_v23  ;;  %v892_v25 = vpop.f32.mrb[1].mxu1 }
 0x3a6   : > { %v486_v26 = vpop.f32.mrb[2].mxu1 }
 0x3a7   : > { %v893_v27 = vpop.f32.mrb[3].mxu1  ;;  %862 = vmatmul.mubr.msk.bf16.vlgmr.msra.gmra.mrb[4].mxu1 %vm384_vm1, %v489_v24 }
 0x47a   : > { %v563_v35 = vpop.f32.mrb[4].mxu1 }
 0x47b   : > { %v565_v36 = vpop.f32.mrb[5].mxu1 }
 0x47c   : > { %v566_v37 = vadd.f32 %v565_v36, %v503_v34  ;;  %v567_v38 = vpop.f32.mrb[6].mxu1 }
 0x47d   : > { %v568_v39 = vpop.f32.mrb[7].mxu1 }
 0x47e   : > { %v570_v40 = vmax.f32 %v566_v37, 0.0 }
 0x480   : > { %v571_v41 = vpack.c.bf16 %v570_v40, %v570_v40 }
 0x482   : > { %899 = vmatmul.mubr.msk.bf16.vlgmr.msra.gmra.mrb[4].mxu0 %vm384_vm1, %v571_v41 }
 0x555   : > { %v632_v43 = vpop.f32.mrb[4].mxu0 }
 0x556   : > { %v633_v44 = vadd.f32 %v863_v42, %v632_v43  ;;  %v900_v45 = vpop.f32.mrb[5].mxu0 }
 0x557   : > { %v635_v46 = vpop.f32.mrb[6].mxu0 }
 0x558   : > { %v867_v47 = vmul.f32 -1.442695, %v633_v44  ;;  %v901_v48 = vpop.f32.mrb[7].mxu0 }
 0x55a   : > { %1025 = vpow2.f32 %v867_v47 }
 0x564   : > { %v1026_v49 = vpop.eup %1025 }
 0x565   : > { %v641_v50 = vadd.f32 1.0, %v1026_v49 }
 0x567   : > { %1027 = vrcp.f32 %v641_v50 }
 0x568   : > { %1212 = shalt.err (!%p1209_p8)
}
 0x569   : > { %s1213_s9 = scalar_lea.hbm %s1637_s29, 128  ;;  %s1217_s17 = scalar_lea.hbm %s1716_s7, 256 }
 0x56a   : > { %p1214_p6 = scmp.ne.s32.totalorder %s1637_s29, %s1213_s9  ;;  %p1218_p9 = scmp.lt.u32.totalorder %s1637_s29, %s1716_s7 }
 0x56b   : > { %p1219_p10 = scmp.lt.u32.totalorder %s1217_s17, %s1213_s9  ;;  %p1221_p11 = scmp.lt.u32.totalorder %s1213_s9, %s1637_s29 }
 0x56c   : > { %p1215_p0 = pnand %p1214_p6, %p1737_p13 }
 0x56d   : > { %p1220_p12 = por %p1219_p10, %p1218_p9 }
 0x56e   : > { %p1216_p2 = pneg %p1215_p0 }
 0x56f   : > { %p1222_p5 = por %p1221_p11, %p1220_p12 }
 0x571   : > { %p1223_p7 = pnand %p1222_p5, %p1216_p2 }
 0x573   : > { %1226 = shalt.err (!%p1223_p7)
}
 0x574   : > { %925 = dma.vmem_to_hbm [thread:$0]  (%p1737_p13), %s686_s22, 128, %s1637_s29, %s659_s14   ;;  %v1028_v51 = vpop.eup %1027  ;;  %v498_v52 = vsub.s32 0, %v497_v31  ;;  %vm648_vm3 = vcmask 72704   ;;  %vm650_vm4 = vcmask 105472  }
 0x575   : > { %s1325_s15 = smov 9   ;;  %s367_s19 = scalar_lea.vmem [#allocation13], %s1600_s18 }
 0x576   : > { %645 = vrot.lane.b32.xlu1 %v1028_v51, %s1325_s15  ;;  %v499_v53 = vrot.slane %v494_v33, %v498_v52  ;;  %s672_s8 = sshll.u32 %s367_s19, 4  ;;  %s1665_s17 = scalar_lea.hbm %s1715_s6, %s870_s16  ;;  %s1667_s8 = int_to_ptr.vmem [resolvable:$true] %s672_s8 }
 0x577   : > { %s654_s29 = scalar_lea.sflag [#allocation4], %s1597_s21  ;;  %s1227_s18 = scalar_lea.vmem %s1667_s8, 128 }
 0x578   : > { %v564_v54 = vadd.f32 %v563_v35, %v499_v53  ;;  %p1228_p4 = scmp.ne.s32.totalorder %s1667_s8, %s1227_s18  ;;  %s1326_s22 = smov [#allocation13]  }
 0x579   : > { %s1231_s30 = sshll.u32 %s1326_s22, 4  ;;  %s1232_s30 = int_to_ptr.vmem [resolvable:$false] %s1231_s30 }
 0x57a   : > { %p1229_p1 = pnand %p1228_p4, %p1737_p13  ;;  %s1233_s14 = scalar_lea.vmem %s1232_s30, 256 }
 0x57b   : > { %p1234_p8 = scmp.lt.s32.totalorder %s1667_s8, %s1232_s30  ;;  %p1235_p6 = scmp.lt.s32.totalorder %s1233_s14, %s1227_s18 }
 0x57c   : > { %p1230_p3 = pneg %p1229_p1 }
 0x57d   : > { %p1236_p0 = por %p1235_p6, %p1234_p8 }
 0x57f   : > { %p1237_p2 = pnand %p1236_p0, %p1230_p3 }
 0x5e8   : > { %v646_v55 = vpop.permute.xlu1 %645 }
 0x5e9   : > { %v649_v56 = vsel %vm648_vm3, %v564_v54, %v646_v55 }
 0x5ea   : > { %v651_v57 = vsel %vm650_vm4, %v649_v56, 0.0 }
 0x5eb   : > { %652 = vst [vmem:[%s367_s19] sm:$0xff] %v651_v57 }
 0x5ec   : > { %1240 = shalt.err (!%p1237_p2)
}
 0x5ed   : > { %s1241_s21 = scalar_lea.hbm %s1665_s17, 128  ;;  %s1245_s10 = scalar_lea.hbm %s1715_s6, 256 }
 0x5ee   : > { %p1242_p9 = scmp.ne.s32.totalorder %s1665_s17, %s1241_s21  ;;  %p1246_p11 = scmp.lt.u32.totalorder %s1665_s17, %s1715_s6 }
 0x5ef   : > { %p1247_p5 = scmp.lt.u32.totalorder %s1245_s10, %s1241_s21  ;;  %p1249_p4 = scmp.lt.u32.totalorder %s1241_s21, %s1665_s17 }
 0x5f0   : > { %p1243_p10 = pnand %p1242_p9, %p1737_p13 }
 0x5f1   : > { %p1248_p7 = por %p1247_p5, %p1246_p11 }
 0x5f2   : > { %p1244_p12 = pneg %p1243_p10 }
 0x5f3   : > { %p1250_p1 = por %p1249_p4, %p1248_p7 }
 0x5f5   : > { %p1251_p3 = pnand %p1250_p1, %p1244_p12 }
 0x5f7   : > { %1254 = shalt.err (!%p1251_p3)
}
 0x5f8   : > { %924 = dma.vmem_to_hbm [thread:$0]  (%p1737_p13), %s1667_s8, 128, %s1665_s17, %s654_s29  }
 0x5f9 PF: > { %s697_s9 = sand.u32 1, %s1297_s24   ;;  %p1738_p8 = scmp.ne.s32.totalorder %s1727_s11, 0 }
 0x5fa   : > { %p1739_p6 = scmp.ge.s32.totalorder %s1309_s27, 2  ;;  %s698_s28 = scalar_lea.sflag [#allocation4], %s697_s9 }
 0x5fc   : > { %p949_p0 = pnand %p1739_p6, %p1738_p8 }
 0x5fe   : > { %1288 = dma.done.wait (!%p949_p0), %s698_s28, 128  }
 0x5ff   : > { %1290 = vsyncadd (!%p949_p0), %s698_s28, 4294967168  ;;  %s707_s18 = scalar_lea.sflag [#allocation15], %s697_s9 }
 0x600   : > { %1292 = dma.done.wait (!%p949_p0), %s707_s18, 128  }
 0x601   : > { %1294 = vsyncadd (!%p949_p0), %s707_s18, 4294967168  ;;  %p27_p13 = scmp.ge.s32.totalorder %s1521_s13, 4   ;;  %s1740_s24 = smov %s1301_s25 }
 0x602   : > { %s1741_s25 = smov %s1305_s26  ;;  %s1742_s26 = smov %s1533_s23 }
 0x603   : > { %s1743_s27 = smov %s1521_s13  ;;  %29 = sbr.rel (!%p27_p13) target bundleno = 10 (0xa), region = 126 }
 0x60a   :  { %712 = vsyncpa [#allocation3], 1 }
 0x60b   :  { %714 = vsyncpa [#allocation3 + $0x1], 1 }
 0x60c   :  { %715 = vsyncpa [#allocation6], 1 }
 0x60d   :  { %716 = vsyncpa [#allocation9], 1 }
 0x60e   :  { %717 = vsyncpa [#allocation12], 1 }
 0x60f   :  { %718 = vsyncpa [#allocation4], 1 }
 0x610   :  { %720 = vsyncpa [#allocation4 + $0x1], 1 }
 0x611   :  { %721 = vsyncpa [#allocation15], 1 }
 0x612   :  { %723 = vsyncpa [#allocation15 + $0x1], 1 }

</bundles_post_ra>
